<compile_context>
chip_gen: v6e
topology: v6e:2x2x1
jax: 0.10.0
libtpu: 0.0.40
codegen_flags: <defaults>
</compile_context>

<pallas_src>
import functools

import jax
import jax.numpy as jnp
from jax.experimental import pallas as pl
from jax.experimental.pallas import tpu as pltpu


# --------------------------------------------------------------------------
# Kernel helpers
# --------------------------------------------------------------------------

def _layer_norm(x, gamma, beta, eps=1e-5):
    """PyTorch LayerNorm over the last dim (biased variance, eps=1e-5)."""
    mu = jnp.mean(x, axis=-1, keepdims=True)
    var = jnp.mean((x - mu) ** 2, axis=-1, keepdims=True)
    return (x - mu) * jax.lax.rsqrt(var + eps) * gamma + beta


def _softmax_lastdim(s):
    s = s - jnp.max(s, axis=-1, keepdims=True)
    p = jnp.exp(s)
    denom = jnp.sum(p, axis=-1, keepdims=True)
    return p * pl.reciprocal(denom, approx=True)   # EUP slot, frees VALU


# --------------------------------------------------------------------------
# Fused kernel: num_layers encoder layers + final fc, single launch
# --------------------------------------------------------------------------

def transformer_kernel(x_ref,
                       wq_ref, wk_ref, wv_ref, bq_ref, bk_ref, bv_ref,
                       wo_ref, bo_ref, ln1w_ref, ln1b_ref,
                       w1_ref, b1_ref, w2_ref, b2_ref, ln2w_ref, ln2b_ref,
                       fcw_ref, fcb_ref, o_ref,
                       *, num_layers, num_heads, batch, seq):
    B, S = batch, seq
    E = x_ref.shape[-1]
    hd = E // num_heads
    scale = 1.0 / float(hd) ** 0.5

    # All B*S token rows as one flat slab for the row-wise matmuls.
    x = x_ref[...].reshape(B * S, E)                         # (B*S, E)

    for l in range(num_layers):        # static unroll; weights stay in VMEM
        # ---- multi-head self attention ----
        attn = jnp.zeros((B * S, E), jnp.float32)
        for h in range(num_heads):     # per-head weights pre-split: no lane slicing
            qh = jnp.dot(x, wq_ref[l, h], preferred_element_type=jnp.float32) + bq_ref[l, h]
            kh = jnp.dot(x, wk_ref[l, h], preferred_element_type=jnp.float32) + bk_ref[l, h]
            vh = jnp.dot(x, wv_ref[l, h], preferred_element_type=jnp.float32) + bv_ref[l, h]
            qh3 = qh.reshape(B, S, hd)
            kh3 = kh.reshape(B, S, hd)
            vh3 = vh.reshape(B, S, hd)
            s = jnp.einsum('bqd,bkd->bqk', qh3, kh3,
                           preferred_element_type=jnp.float32) * scale    # (B, S, S)
            p = _softmax_lastdim(s)
            oh = jnp.einsum('bqk,bkd->bqd', p, vh3,
                            preferred_element_type=jnp.float32)           # (B, S, hd)
            # concat(heads) @ Wo^T  ==  sum_h head_h @ Wo^T[h*hd:(h+1)*hd, :]
            attn = attn + jnp.dot(oh.reshape(B * S, hd), wo_ref[l, h],
                                  preferred_element_type=jnp.float32)
        attn = attn + bo_ref[l]

        # ---- residual + LayerNorm 1 (dropout = identity at inference) ----
        x1 = _layer_norm(x + attn, ln1w_ref[l], ln1b_ref[l])

        # ---- feed-forward: relu(x @ W1^T + b1) @ W2^T + b2 ----
        ff = jnp.dot(x1, w1_ref[l], preferred_element_type=jnp.float32) + b1_ref[l]
        ff = jnp.maximum(ff, 0.0)
        ff = jnp.dot(ff, w2_ref[l], preferred_element_type=jnp.float32) + b2_ref[l]

        # ---- residual + LayerNorm 2 ----
        x = _layer_norm(x1 + ff, ln2w_ref[l], ln2b_ref[l])

    # ---- final Linear on the last timestep of every sequence ----
    x_last = x.reshape(B, S, E)[:, S - 1, :]                 # (B, E)
    o_ref[...] = (jnp.dot(x_last, fcw_ref[...], preferred_element_type=jnp.float32)
                  + fcb_ref[...])


# --------------------------------------------------------------------------
# Wrapper
# --------------------------------------------------------------------------

def transformer_forward(x, params, *, num_heads=2):
    B, S, E = x.shape
    L = params["wq_t"].shape[0]
    O = params["fc_w_t"].shape[1]

    kernel = functools.partial(transformer_kernel, num_layers=L,
                               num_heads=num_heads, batch=B, seq=S)
    args = (x,
            params["wq_t"], params["wk_t"], params["wv_t"],
            params["bq"], params["bk"], params["bv"],
            params["wo_t"], params["bo"],
            params["ln1_w"], params["ln1_b"],
            params["w1_t"], params["b1"],
            params["w2_t"], params["b2"],
            params["ln2_w"], params["ln2_b"],
            params["fc_w_t"], params["fc_b"])

    vmem_spec = pl.BlockSpec(memory_space=pltpu.MemorySpace.VMEM)
    # TODO(synk): for large E/H (esp. v7x 64 MiB VMEM) tile the FFN over a K-reduction grid axis instead of keeping full weights resident.
    return pl.pallas_call(
        kernel,
        out_shape=jax.ShapeDtypeStruct((B, O), jnp.float32),
        in_specs=[vmem_spec] * len(args),
        out_specs=vmem_spec,
        compiler_params=pltpu.CompilerParams(vmem_limit_bytes=64 * 1024 * 1024),
    )(*args)


# --------------------------------------------------------------------------
# Deterministic parameter init (synthetic weights, not a checkpoint)
# --------------------------------------------------------------------------

def init_params(key, input_dim, hidden_dim, output_dim, num_layers, num_heads=2):
    E, H, O, L = input_dim, hidden_dim, output_dim, num_layers
    hd = E // num_heads

    per_layer = {k: [] for k in
                 ("wq_t", "wk_t", "wv_t", "bq", "bk", "bv",
                  "wo_t", "bo", "ln1_w", "ln1_b",
                  "w1_t", "b1", "w2_t", "b2", "ln2_w", "ln2_b")}

    for _ in range(L):
        key, *ks = jax.random.split(key, 9)
        wqkv = 0.1 * jax.random.normal(ks[0], (3 * E, E), jnp.float32)   # in_proj_weight
        bqkv = 0.1 * jax.random.normal(ks[1], (3 * E,), jnp.float32)     # in_proj_bias
        wo = 0.1 * jax.random.normal(ks[2], (E, E), jnp.float32)         # out_proj.weight
        bo = 0.1 * jax.random.normal(ks[3], (E,), jnp.float32)
        w1 = 0.1 * jax.random.normal(ks[4], (H, E), jnp.float32)         # linear1.weight
        b1 = 0.1 * jax.random.normal(ks[5], (H,), jnp.float32)
        w2 = 0.1 * jax.random.normal(ks[6], (E, H), jnp.float32)         # linear2.weight
        b2 = 0.1 * jax.random.normal(ks[7], (E,), jnp.float32)

        wq, wk, wv = wqkv[:E], wqkv[E:2 * E], wqkv[2 * E:]
        bq, bk, bv = bqkv[:E], bqkv[E:2 * E], bqkv[2 * E:]
        wot = wo.T                                                       # y = attn @ wo.T + bo

        # Pre-split per head host-side so the kernel never slices lanes.
        per_layer["wq_t"].append(jnp.stack([wq[h * hd:(h + 1) * hd].T for h in range(num_heads)]))
        per_layer["wk_t"].append(jnp.stack([wk[h * hd:(h + 1) * hd].T for h in range(num_heads)]))
        per_layer["wv_t"].append(jnp.stack([wv[h * hd:(h + 1) * hd].T for h in range(num_heads)]))
        per_layer["bq"].append(jnp.stack([bq[h * hd:(h + 1) * hd].reshape(1, hd) for h in range(num_heads)]))
        per_layer["bk"].append(jnp.stack([bk[h * hd:(h + 1) * hd].reshape(1, hd) for h in range(num_heads)]))
        per_layer["bv"].append(jnp.stack([bv[h * hd:(h + 1) * hd].reshape(1, hd) for h in range(num_heads)]))
        per_layer["wo_t"].append(jnp.stack([wot[h * hd:(h + 1) * hd] for h in range(num_heads)]))
        per_layer["bo"].append(bo.reshape(1, E))
        per_layer["ln1_w"].append(jnp.ones((1, E), jnp.float32))
        per_layer["ln1_b"].append(jnp.zeros((1, E), jnp.float32))
        per_layer["w1_t"].append(w1.T)
        per_layer["b1"].append(b1.reshape(1, H))
        per_layer["w2_t"].append(w2.T)
        per_layer["b2"].append(b2.reshape(1, E))
        per_layer["ln2_w"].append(jnp.ones((1, E), jnp.float32))
        per_layer["ln2_b"].append(jnp.zeros((1, E), jnp.float32))

    params = {k: jnp.stack(v) for k, v in per_layer.items()}

    key, k1, k2 = jax.random.split(key, 3)
    fc_w = 0.1 * jax.random.normal(k1, (O, E), jnp.float32)
    fc_b = 0.1 * jax.random.normal(k2, (O,), jnp.float32)
    params["fc_w_t"] = fc_w.T
    params["fc_b"] = fc_b.reshape(1, O)
    return params


# --------------------------------------------------------------------------
# Main
# --------------------------------------------------------------------------

if __name__ == "__main__":
    B, S = 2, 8
    input_dim, hidden_dim, output_dim, num_layers = 32, 32, 4, 2

    key = jax.random.PRNGKey(0)
    key, xk = jax.random.split(key)
    x = jax.random.normal(xk, (B, S, input_dim), jnp.float32)

    params = init_params(key, input_dim, hidden_dim, output_dim, num_layers)

    out = transformer_forward(x, params)
    out = jax.block_until_ready(out)
    assert out.shape == (B, output_dim)
    assert bool(jnp.all(jnp.isfinite(out)))
    print("KERNEL_OK")
</pallas_src>

<mosaic_0001>
module attributes {stable_mosaic.version = 11 : i64} {
  func.func @transformer_kernel(%arg0: memref<2x8x32xf32, #tpu.memory_space<vmem>>, %arg1: memref<2x2x32x16xf32, #tpu.memory_space<vmem>>, %arg2: memref<2x2x32x16xf32, #tpu.memory_space<vmem>>, %arg3: memref<2x2x32x16xf32, #tpu.memory_space<vmem>>, %arg4: memref<2x2x1x16xf32, #tpu.memory_space<vmem>>, %arg5: memref<2x2x1x16xf32, #tpu.memory_space<vmem>>, %arg6: memref<2x2x1x16xf32, #tpu.memory_space<vmem>>, %arg7: memref<2x2x16x32xf32, #tpu.memory_space<vmem>>, %arg8: memref<2x1x32xf32, #tpu.memory_space<vmem>>, %arg9: memref<2x1x32xf32, #tpu.memory_space<vmem>>, %arg10: memref<2x1x32xf32, #tpu.memory_space<vmem>>, %arg11: memref<2x32x32xf32, #tpu.memory_space<vmem>>, %arg12: memref<2x1x32xf32, #tpu.memory_space<vmem>>, %arg13: memref<2x32x32xf32, #tpu.memory_space<vmem>>, %arg14: memref<2x1x32xf32, #tpu.memory_space<vmem>>, %arg15: memref<2x1x32xf32, #tpu.memory_space<vmem>>, %arg16: memref<2x1x32xf32, #tpu.memory_space<vmem>>, %arg17: memref<32x4xf32, #tpu.memory_space<vmem>>, %arg18: memref<1x4xf32, #tpu.memory_space<vmem>>, %arg19: memref<2x4xf32, #tpu.memory_space<vmem>>) attributes {dimension_semantics = [], scalar_prefetch = 0 : i64, scratch_operands = 0 : i64, tpu.core_type = #tpu.core_type<tc>} {
    %c0 = arith.constant 0 : index
    %c0_0 = arith.constant 0 : index
    %c0_1 = arith.constant 0 : index
    %0 = vector.load %arg0[%c0, %c0_0, %c0_1] : memref<2x8x32xf32, #tpu.memory_space<vmem>>, vector<2x8x32xf32>
    %1 = vector.shape_cast %0 : vector<2x8x32xf32> to vector<16x32xf32>
    %cst = arith.constant 0.000000e+00 : f32
    %2 = vector.broadcast %cst : f32 to vector<16x32xf32>
    %c0_2 = arith.constant 0 : index
    %c0_3 = arith.constant 0 : index
    %c0_4 = arith.constant 0 : index
    %c0_5 = arith.constant 0 : index
    %3 = vector.load %arg1[%c0_2, %c0_3, %c0_4, %c0_5] : memref<2x2x32x16xf32, #tpu.memory_space<vmem>>, vector<1x1x32x16xf32>
    %4 = vector.shape_cast %3 : vector<1x1x32x16xf32> to vector<32x16xf32>
    %cst_6 = arith.constant dense<0.000000e+00> : vector<16x16xf32>
    %5 = tpu.matmul %1, %4, %cst_6 {dimension_numbers = #tpu.dot_dimension_numbers<[1], [0], [0], [1], [0, 0, 1, 1], [], []>} : vector<16x32xf32>, vector<32x16xf32>, vector<16x16xf32> -> vector<16x16xf32>
    %c0_7 = arith.constant 0 : index
    %c0_8 = arith.constant 0 : index
    %c0_9 = arith.constant 0 : index
    %c0_10 = arith.constant 0 : index
    %6 = vector.load %arg4[%c0_7, %c0_8, %c0_9, %c0_10] : memref<2x2x1x16xf32, #tpu.memory_space<vmem>>, vector<1x1x1x16xf32>
    %7 = vector.shape_cast %6 : vector<1x1x1x16xf32> to vector<1x16xf32>
    %8 = vector.broadcast %7 : vector<1x16xf32> to vector<16x16xf32>
    %9 = arith.addf %5, %8 : vector<16x16xf32>
    %c0_11 = arith.constant 0 : index
    %c0_12 = arith.constant 0 : index
    %c0_13 = arith.constant 0 : index
    %c0_14 = arith.constant 0 : index
    %10 = vector.load %arg2[%c0_11, %c0_12, %c0_13, %c0_14] : memref<2x2x32x16xf32, #tpu.memory_space<vmem>>, vector<1x1x32x16xf32>
    %11 = vector.shape_cast %10 : vector<1x1x32x16xf32> to vector<32x16xf32>
    %cst_15 = arith.constant dense<0.000000e+00> : vector<16x16xf32>
    %12 = tpu.matmul %1, %11, %cst_15 {dimension_numbers = #tpu.dot_dimension_numbers<[1], [0], [0], [1], [0, 0, 1, 1], [], []>} : vector<16x32xf32>, vector<32x16xf32>, vector<16x16xf32> -> vector<16x16xf32>
    %c0_16 = arith.constant 0 : index
    %c0_17 = arith.constant 0 : index
    %c0_18 = arith.constant 0 : index
    %c0_19 = arith.constant 0 : index
    %13 = vector.load %arg5[%c0_16, %c0_17, %c0_18, %c0_19] : memref<2x2x1x16xf32, #tpu.memory_space<vmem>>, vector<1x1x1x16xf32>
    %14 = vector.shape_cast %13 : vector<1x1x1x16xf32> to vector<1x16xf32>
    %15 = vector.broadcast %14 : vector<1x16xf32> to vector<16x16xf32>
    %16 = arith.addf %12, %15 : vector<16x16xf32>
    %c0_20 = arith.constant 0 : index
    %c0_21 = arith.constant 0 : index
    %c0_22 = arith.constant 0 : index
    %c0_23 = arith.constant 0 : index
    %17 = vector.load %arg3[%c0_20, %c0_21, %c0_22, %c0_23] : memref<2x2x32x16xf32, #tpu.memory_space<vmem>>, vector<1x1x32x16xf32>
    %18 = vector.shape_cast %17 : vector<1x1x32x16xf32> to vector<32x16xf32>
    %cst_24 = arith.constant dense<0.000000e+00> : vector<16x16xf32>
    %19 = tpu.matmul %1, %18, %cst_24 {dimension_numbers = #tpu.dot_dimension_numbers<[1], [0], [0], [1], [0, 0, 1, 1], [], []>} : vector<16x32xf32>, vector<32x16xf32>, vector<16x16xf32> -> vector<16x16xf32>
    %c0_25 = arith.constant 0 : index
    %c0_26 = arith.constant 0 : index
    %c0_27 = arith.constant 0 : index
    %c0_28 = arith.constant 0 : index
    %20 = vector.load %arg6[%c0_25, %c0_26, %c0_27, %c0_28] : memref<2x2x1x16xf32, #tpu.memory_space<vmem>>, vector<1x1x1x16xf32>
    %21 = vector.shape_cast %20 : vector<1x1x1x16xf32> to vector<1x16xf32>
    %22 = vector.broadcast %21 : vector<1x16xf32> to vector<16x16xf32>
    %23 = arith.addf %19, %22 : vector<16x16xf32>
    %24 = vector.shape_cast %9 : vector<16x16xf32> to vector<2x8x16xf32>
    %25 = vector.shape_cast %16 : vector<16x16xf32> to vector<2x8x16xf32>
    %26 = vector.shape_cast %23 : vector<16x16xf32> to vector<2x8x16xf32>
    "tpu.trace_start"() <{level = 10 : i32, message = "bqd,bkd->bqk"}> : () -> ()
    %cst_29 = arith.constant dense<0.000000e+00> : vector<2x8x8xf32>
    %27 = tpu.matmul %24, %25, %cst_29 {dimension_numbers = #tpu.dot_dimension_numbers<[2], [2], [1], [1], [0, 0, 0, 1, 1, 1], [0], [0]>} : vector<2x8x16xf32>, vector<2x8x16xf32>, vector<2x8x8xf32> -> vector<2x8x8xf32>
    "tpu.trace_stop"() : () -> ()
    %cst_30 = arith.constant 2.500000e-01 : f32
    %28 = vector.broadcast %cst_30 : f32 to vector<2x8x8xf32>
    %29 = arith.mulf %27, %28 : vector<2x8x8xf32>
    %cst_31 = arith.constant dense<0xFF800000> : vector<2x8xf32>
    %30 = vector.multi_reduction <maximumf>, %29, %cst_31 [2] : vector<2x8x8xf32> to vector<2x8xf32>
    %31 = vector.shape_cast %30 : vector<2x8xf32> to vector<2x8x1xf32>
    %32 = vector.broadcast %31 : vector<2x8x1xf32> to vector<2x8x8xf32>
    %33 = arith.subf %29, %32 : vector<2x8x8xf32>
    %34 = math.exp %33 : vector<2x8x8xf32>
    %cst_32 = arith.constant dense<0.000000e+00> : vector<2x8xf32>
    %35 = vector.multi_reduction <add>, %34, %cst_32 [2] : vector<2x8x8xf32> to vector<2x8xf32>
    %36 = vector.shape_cast %35 : vector<2x8xf32> to vector<2x8x1xf32>
    %37 = tpu.reciprocal %36 {approx = true} : vector<2x8x1xf32> -> vector<2x8x1xf32>
    %38 = vector.broadcast %37 : vector<2x8x1xf32> to vector<2x8x8xf32>
    %39 = arith.mulf %34, %38 : vector<2x8x8xf32>
    "tpu.trace_start"() <{level = 10 : i32, message = "bqk,bkd->bqd"}> : () -> ()
    %cst_33 = arith.constant dense<0.000000e+00> : vector<2x8x16xf32>
    %40 = tpu.matmul %39, %26, %cst_33 {dimension_numbers = #tpu.dot_dimension_numbers<[2], [1], [1], [2], [0, 0, 0, 1, 1, 2], [0], [0]>} : vector<2x8x8xf32>, vector<2x8x16xf32>, vector<2x8x16xf32> -> vector<2x8x16xf32>
    "tpu.trace_stop"() : () -> ()
    %41 = vector.shape_cast %40 : vector<2x8x16xf32> to vector<16x16xf32>
    %c0_34 = arith.constant 0 : index
    %c0_35 = arith.constant 0 : index
    %c0_36 = arith.constant 0 : index
    %c0_37 = arith.constant 0 : index
    %42 = vector.load %arg7[%c0_34, %c0_35, %c0_36, %c0_37] : memref<2x2x16x32xf32, #tpu.memory_space<vmem>>, vector<1x1x16x32xf32>
    %43 = vector.shape_cast %42 : vector<1x1x16x32xf32> to vector<16x32xf32>
    %cst_38 = arith.constant dense<0.000000e+00> : vector<16x32xf32>
    %44 = tpu.matmul %41, %43, %cst_38 {dimension_numbers = #tpu.dot_dimension_numbers<[1], [0], [0], [1], [0, 0, 1, 1], [], []>} : vector<16x16xf32>, vector<16x32xf32>, vector<16x32xf32> -> vector<16x32xf32>
    %45 = arith.addf %2, %44 : vector<16x32xf32>
    %c0_39 = arith.constant 0 : index
    %c1 = arith.constant 1 : index
    %c0_40 = arith.constant 0 : index
    %c0_41 = arith.constant 0 : index
    %46 = vector.load %arg1[%c0_39, %c1, %c0_40, %c0_41] : memref<2x2x32x16xf32, #tpu.memory_space<vmem>>, vector<1x1x32x16xf32>
    %47 = vector.shape_cast %46 : vector<1x1x32x16xf32> to vector<32x16xf32>
    %cst_42 = arith.constant dense<0.000000e+00> : vector<16x16xf32>
    %48 = tpu.matmul %1, %47, %cst_42 {dimension_numbers = #tpu.dot_dimension_numbers<[1], [0], [0], [1], [0, 0, 1, 1], [], []>} : vector<16x32xf32>, vector<32x16xf32>, vector<16x16xf32> -> vector<16x16xf32>
    %c0_43 = arith.constant 0 : index
    %c1_44 = arith.constant 1 : index
    %c0_45 = arith.constant 0 : index
    %c0_46 = arith.constant 0 : index
    %49 = vector.load %arg4[%c0_43, %c1_44, %c0_45, %c0_46] : memref<2x2x1x16xf32, #tpu.memory_space<vmem>>, vector<1x1x1x16xf32>
    %50 = vector.shape_cast %49 : vector<1x1x1x16xf32> to vector<1x16xf32>
    %51 = vector.broadcast %50 : vector<1x16xf32> to vector<16x16xf32>
    %52 = arith.addf %48, %51 : vector<16x16xf32>
    %c0_47 = arith.constant 0 : index
    %c1_48 = arith.constant 1 : index
    %c0_49 = arith.constant 0 : index
    %c0_50 = arith.constant 0 : index
    %53 = vector.load %arg2[%c0_47, %c1_48, %c0_49, %c0_50] : memref<2x2x32x16xf32, #tpu.memory_space<vmem>>, vector<1x1x32x16xf32>
    %54 = vector.shape_cast %53 : vector<1x1x32x16xf32> to vector<32x16xf32>
    %cst_51 = arith.constant dense<0.000000e+00> : vector<16x16xf32>
    %55 = tpu.matmul %1, %54, %cst_51 {dimension_numbers = #tpu.dot_dimension_numbers<[1], [0], [0], [1], [0, 0, 1, 1], [], []>} : vector<16x32xf32>, vector<32x16xf32>, vector<16x16xf32> -> vector<16x16xf32>
    %c0_52 = arith.constant 0 : index
    %c1_53 = arith.constant 1 : index
    %c0_54 = arith.constant 0 : index
    %c0_55 = arith.constant 0 : index
    %56 = vector.load %arg5[%c0_52, %c1_53, %c0_54, %c0_55] : memref<2x2x1x16xf32, #tpu.memory_space<vmem>>, vector<1x1x1x16xf32>
    %57 = vector.shape_cast %56 : vector<1x1x1x16xf32> to vector<1x16xf32>
    %58 = vector.broadcast %57 : vector<1x16xf32> to vector<16x16xf32>
    %59 = arith.addf %55, %58 : vector<16x16xf32>
    %c0_56 = arith.constant 0 : index
    %c1_57 = arith.constant 1 : index
    %c0_58 = arith.constant 0 : index
    %c0_59 = arith.constant 0 : index
    %60 = vector.load %arg3[%c0_56, %c1_57, %c0_58, %c0_59] : memref<2x2x32x16xf32, #tpu.memory_space<vmem>>, vector<1x1x32x16xf32>
    %61 = vector.shape_cast %60 : vector<1x1x32x16xf32> to vector<32x16xf32>
    %cst_60 = arith.constant dense<0.000000e+00> : vector<16x16xf32>
    %62 = tpu.matmul %1, %61, %cst_60 {dimension_numbers = #tpu.dot_dimension_numbers<[1], [0], [0], [1], [0, 0, 1, 1], [], []>} : vector<16x32xf32>, vector<32x16xf32>, vector<16x16xf32> -> vector<16x16xf32>
    %c0_61 = arith.constant 0 : index
    %c1_62 = arith.constant 1 : index
    %c0_63 = arith.constant 0 : index
    %c0_64 = arith.constant 0 : index
    %63 = vector.load %arg6[%c0_61, %c1_62, %c0_63, %c0_64] : memref<2x2x1x16xf32, #tpu.memory_space<vmem>>, vector<1x1x1x16xf32>
    %64 = vector.shape_cast %63 : vector<1x1x1x16xf32> to vector<1x16xf32>
    %65 = vector.broadcast %64 : vector<1x16xf32> to vector<16x16xf32>
    %66 = arith.addf %62, %65 : vector<16x16xf32>
    %67 = vector.shape_cast %52 : vector<16x16xf32> to vector<2x8x16xf32>
    %68 = vector.shape_cast %59 : vector<16x16xf32> to vector<2x8x16xf32>
    %69 = vector.shape_cast %66 : vector<16x16xf32> to vector<2x8x16xf32>
    "tpu.trace_start"() <{level = 10 : i32, message = "bqd,bkd->bqk"}> : () -> ()
    %cst_65 = arith.constant dense<0.000000e+00> : vector<2x8x8xf32>
    %70 = tpu.matmul %67, %68, %cst_65 {dimension_numbers = #tpu.dot_dimension_numbers<[2], [2], [1], [1], [0, 0, 0, 1, 1, 1], [0], [0]>} : vector<2x8x16xf32>, vector<2x8x16xf32>, vector<2x8x8xf32> -> vector<2x8x8xf32>
    "tpu.trace_stop"() : () -> ()
    %cst_66 = arith.constant 2.500000e-01 : f32
    %71 = vector.broadcast %cst_66 : f32 to vector<2x8x8xf32>
    %72 = arith.mulf %70, %71 : vector<2x8x8xf32>
    %cst_67 = arith.constant dense<0xFF800000> : vector<2x8xf32>
    %73 = vector.multi_reduction <maximumf>, %72, %cst_67 [2] : vector<2x8x8xf32> to vector<2x8xf32>
    %74 = vector.shape_cast %73 : vector<2x8xf32> to vector<2x8x1xf32>
    %75 = vector.broadcast %74 : vector<2x8x1xf32> to vector<2x8x8xf32>
    %76 = arith.subf %72, %75 : vector<2x8x8xf32>
    %77 = math.exp %76 : vector<2x8x8xf32>
    %cst_68 = arith.constant dense<0.000000e+00> : vector<2x8xf32>
    %78 = vector.multi_reduction <add>, %77, %cst_68 [2] : vector<2x8x8xf32> to vector<2x8xf32>
    %79 = vector.shape_cast %78 : vector<2x8xf32> to vector<2x8x1xf32>
    %80 = tpu.reciprocal %79 {approx = true} : vector<2x8x1xf32> -> vector<2x8x1xf32>
    %81 = vector.broadcast %80 : vector<2x8x1xf32> to vector<2x8x8xf32>
    %82 = arith.mulf %77, %81 : vector<2x8x8xf32>
    "tpu.trace_start"() <{level = 10 : i32, message = "bqk,bkd->bqd"}> : () -> ()
    %cst_69 = arith.constant dense<0.000000e+00> : vector<2x8x16xf32>
    %83 = tpu.matmul %82, %69, %cst_69 {dimension_numbers = #tpu.dot_dimension_numbers<[2], [1], [1], [2], [0, 0, 0, 1, 1, 2], [0], [0]>} : vector<2x8x8xf32>, vector<2x8x16xf32>, vector<2x8x16xf32> -> vector<2x8x16xf32>
    "tpu.trace_stop"() : () -> ()
    %84 = vector.shape_cast %83 : vector<2x8x16xf32> to vector<16x16xf32>
    %c0_70 = arith.constant 0 : index
    %c1_71 = arith.constant 1 : index
    %c0_72 = arith.constant 0 : index
    %c0_73 = arith.constant 0 : index
    %85 = vector.load %arg7[%c0_70, %c1_71, %c0_72, %c0_73] : memref<2x2x16x32xf32, #tpu.memory_space<vmem>>, vector<1x1x16x32xf32>
    %86 = vector.shape_cast %85 : vector<1x1x16x32xf32> to vector<16x32xf32>
    %cst_74 = arith.constant dense<0.000000e+00> : vector<16x32xf32>
    %87 = tpu.matmul %84, %86, %cst_74 {dimension_numbers = #tpu.dot_dimension_numbers<[1], [0], [0], [1], [0, 0, 1, 1], [], []>} : vector<16x16xf32>, vector<16x32xf32>, vector<16x32xf32> -> vector<16x32xf32>
    %88 = arith.addf %45, %87 : vector<16x32xf32>
    %c0_75 = arith.constant 0 : index
    %c0_76 = arith.constant 0 : index
    %c0_77 = arith.constant 0 : index
    %89 = vector.load %arg8[%c0_75, %c0_76, %c0_77] : memref<2x1x32xf32, #tpu.memory_space<vmem>>, vector<1x1x32xf32>
    %90 = vector.shape_cast %89 : vector<1x1x32xf32> to vector<1x32xf32>
    %91 = vector.broadcast %90 : vector<1x32xf32> to vector<16x32xf32>
    %92 = arith.addf %88, %91 : vector<16x32xf32>
    %93 = arith.addf %1, %92 : vector<16x32xf32>
    %c0_78 = arith.constant 0 : index
    %c0_79 = arith.constant 0 : index
    %c0_80 = arith.constant 0 : index
    %94 = vector.load %arg9[%c0_78, %c0_79, %c0_80] : memref<2x1x32xf32, #tpu.memory_space<vmem>>, vector<1x1x32xf32>
    %95 = vector.shape_cast %94 : vector<1x1x32xf32> to vector<1x32xf32>
    %c0_81 = arith.constant 0 : index
    %c0_82 = arith.constant 0 : index
    %c0_83 = arith.constant 0 : index
    %96 = vector.load %arg10[%c0_81, %c0_82, %c0_83] : memref<2x1x32xf32, #tpu.memory_space<vmem>>, vector<1x1x32xf32>
    %97 = vector.shape_cast %96 : vector<1x1x32xf32> to vector<1x32xf32>
    %cst_84 = arith.constant dense<0.000000e+00> : vector<16xf32>
    %98 = vector.multi_reduction <add>, %93, %cst_84 [1] : vector<16x32xf32> to vector<16xf32>
    %99 = vector.shape_cast %98 : vector<16xf32> to vector<16x1xf32>
    %cst_85 = arith.constant 3.200000e+01 : f32
    %100 = vector.broadcast %cst_85 : f32 to vector<16x1xf32>
    %101 = arith.divf %99, %100 : vector<16x1xf32>
    %102 = vector.broadcast %101 : vector<16x1xf32> to vector<16x32xf32>
    %103 = arith.subf %93, %102 : vector<16x32xf32>
    %104 = arith.mulf %103, %103 : vector<16x32xf32>
    %cst_86 = arith.constant dense<0.000000e+00> : vector<16xf32>
    %105 = vector.multi_reduction <add>, %104, %cst_86 [1] : vector<16x32xf32> to vector<16xf32>
    %106 = vector.shape_cast %105 : vector<16xf32> to vector<16x1xf32>
    %cst_87 = arith.constant 3.200000e+01 : f32
    %107 = vector.broadcast %cst_87 : f32 to vector<16x1xf32>
    %108 = arith.divf %106, %107 : vector<16x1xf32>
    %109 = vector.broadcast %101 : vector<16x1xf32> to vector<16x32xf32>
    %110 = arith.subf %93, %109 : vector<16x32xf32>
    %cst_88 = arith.constant 9.99999974E-6 : f32
    %111 = vector.broadcast %cst_88 : f32 to vector<16x1xf32>
    %112 = arith.addf %108, %111 : vector<16x1xf32>
    %113 = math.rsqrt %112 : vector<16x1xf32>
    %114 = vector.broadcast %113 : vector<16x1xf32> to vector<16x32xf32>
    %115 = arith.mulf %110, %114 : vector<16x32xf32>
    %116 = vector.broadcast %95 : vector<1x32xf32> to vector<16x32xf32>
    %117 = arith.mulf %115, %116 : vector<16x32xf32>
    %118 = vector.broadcast %97 : vector<1x32xf32> to vector<16x32xf32>
    %119 = arith.addf %117, %118 : vector<16x32xf32>
    %c0_89 = arith.constant 0 : index
    %c0_90 = arith.constant 0 : index
    %c0_91 = arith.constant 0 : index
    %120 = vector.load %arg11[%c0_89, %c0_90, %c0_91] : memref<2x32x32xf32, #tpu.memory_space<vmem>>, vector<1x32x32xf32>
    %121 = vector.shape_cast %120 : vector<1x32x32xf32> to vector<32x32xf32>
    %cst_92 = arith.constant dense<0.000000e+00> : vector<16x32xf32>
    %122 = tpu.matmul %119, %121, %cst_92 {dimension_numbers = #tpu.dot_dimension_numbers<[1], [0], [0], [1], [0, 0, 1, 1], [], []>} : vector<16x32xf32>, vector<32x32xf32>, vector<16x32xf32> -> vector<16x32xf32>
    %c0_93 = arith.constant 0 : index
    %c0_94 = arith.constant 0 : index
    %c0_95 = arith.constant 0 : index
    %123 = vector.load %arg12[%c0_93, %c0_94, %c0_95] : memref<2x1x32xf32, #tpu.memory_space<vmem>>, vector<1x1x32xf32>
    %124 = vector.shape_cast %123 : vector<1x1x32xf32> to vector<1x32xf32>
    %125 = vector.broadcast %124 : vector<1x32xf32> to vector<16x32xf32>
    %126 = arith.addf %122, %125 : vector<16x32xf32>
    %cst_96 = arith.constant 0.000000e+00 : f32
    %127 = vector.broadcast %cst_96 : f32 to vector<16x32xf32>
    %128 = arith.maximumf %126, %127 : vector<16x32xf32>
    %c0_97 = arith.constant 0 : index
    %c0_98 = arith.constant 0 : index
    %c0_99 = arith.constant 0 : index
    %129 = vector.load %arg13[%c0_97, %c0_98, %c0_99] : memref<2x32x32xf32, #tpu.memory_space<vmem>>, vector<1x32x32xf32>
    %130 = vector.shape_cast %129 : vector<1x32x32xf32> to vector<32x32xf32>
    %cst_100 = arith.constant dense<0.000000e+00> : vector<16x32xf32>
    %131 = tpu.matmul %128, %130, %cst_100 {dimension_numbers = #tpu.dot_dimension_numbers<[1], [0], [0], [1], [0, 0, 1, 1], [], []>} : vector<16x32xf32>, vector<32x32xf32>, vector<16x32xf32> -> vector<16x32xf32>
    %c0_101 = arith.constant 0 : index
    %c0_102 = arith.constant 0 : index
    %c0_103 = arith.constant 0 : index
    %132 = vector.load %arg14[%c0_101, %c0_102, %c0_103] : memref<2x1x32xf32, #tpu.memory_space<vmem>>, vector<1x1x32xf32>
    %133 = vector.shape_cast %132 : vector<1x1x32xf32> to vector<1x32xf32>
    %134 = vector.broadcast %133 : vector<1x32xf32> to vector<16x32xf32>
    %135 = arith.addf %131, %134 : vector<16x32xf32>
    %136 = arith.addf %119, %135 : vector<16x32xf32>
    %c0_104 = arith.constant 0 : index
    %c0_105 = arith.constant 0 : index
    %c0_106 = arith.constant 0 : index
    %137 = vector.load %arg15[%c0_104, %c0_105, %c0_106] : memref<2x1x32xf32, #tpu.memory_space<vmem>>, vector<1x1x32xf32>
    %138 = vector.shape_cast %137 : vector<1x1x32xf32> to vector<1x32xf32>
    %c0_107 = arith.constant 0 : index
    %c0_108 = arith.constant 0 : index
    %c0_109 = arith.constant 0 : index
    %139 = vector.load %arg16[%c0_107, %c0_108, %c0_109] : memref<2x1x32xf32, #tpu.memory_space<vmem>>, vector<1x1x32xf32>
    %140 = vector.shape_cast %139 : vector<1x1x32xf32> to vector<1x32xf32>
    %cst_110 = arith.constant dense<0.000000e+00> : vector<16xf32>
    %141 = vector.multi_reduction <add>, %136, %cst_110 [1] : vector<16x32xf32> to vector<16xf32>
    %142 = vector.shape_cast %141 : vector<16xf32> to vector<16x1xf32>
    %cst_111 = arith.constant 3.200000e+01 : f32
    %143 = vector.broadcast %cst_111 : f32 to vector<16x1xf32>
    %144 = arith.divf %142, %143 : vector<16x1xf32>
    %145 = vector.broadcast %144 : vector<16x1xf32> to vector<16x32xf32>
    %146 = arith.subf %136, %145 : vector<16x32xf32>
    %147 = arith.mulf %146, %146 : vector<16x32xf32>
    %cst_112 = arith.constant dense<0.000000e+00> : vector<16xf32>
    %148 = vector.multi_reduction <add>, %147, %cst_112 [1] : vector<16x32xf32> to vector<16xf32>
    %149 = vector.shape_cast %148 : vector<16xf32> to vector<16x1xf32>
    %cst_113 = arith.constant 3.200000e+01 : f32
    %150 = vector.broadcast %cst_113 : f32 to vector<16x1xf32>
    %151 = arith.divf %149, %150 : vector<16x1xf32>
    %152 = vector.broadcast %144 : vector<16x1xf32> to vector<16x32xf32>
    %153 = arith.subf %136, %152 : vector<16x32xf32>
    %cst_114 = arith.constant 9.99999974E-6 : f32
    %154 = vector.broadcast %cst_114 : f32 to vector<16x1xf32>
    %155 = arith.addf %151, %154 : vector<16x1xf32>
    %156 = math.rsqrt %155 : vector<16x1xf32>
    %157 = vector.broadcast %156 : vector<16x1xf32> to vector<16x32xf32>
    %158 = arith.mulf %153, %157 : vector<16x32xf32>
    %159 = vector.broadcast %138 : vector<1x32xf32> to vector<16x32xf32>
    %160 = arith.mulf %158, %159 : vector<16x32xf32>
    %161 = vector.broadcast %140 : vector<1x32xf32> to vector<16x32xf32>
    %162 = arith.addf %160, %161 : vector<16x32xf32>
    %cst_115 = arith.constant 0.000000e+00 : f32
    %163 = vector.broadcast %cst_115 : f32 to vector<16x32xf32>
    %c1_116 = arith.constant 1 : index
    %c0_117 = arith.constant 0 : index
    %c0_118 = arith.constant 0 : index
    %c0_119 = arith.constant 0 : index
    %164 = vector.load %arg1[%c1_116, %c0_117, %c0_118, %c0_119] : memref<2x2x32x16xf32, #tpu.memory_space<vmem>>, vector<1x1x32x16xf32>
    %165 = vector.shape_cast %164 : vector<1x1x32x16xf32> to vector<32x16xf32>
    %cst_120 = arith.constant dense<0.000000e+00> : vector<16x16xf32>
    %166 = tpu.matmul %162, %165, %cst_120 {dimension_numbers = #tpu.dot_dimension_numbers<[1], [0], [0], [1], [0, 0, 1, 1], [], []>} : vector<16x32xf32>, vector<32x16xf32>, vector<16x16xf32> -> vector<16x16xf32>
    %c1_121 = arith.constant 1 : index
    %c0_122 = arith.constant 0 : index
    %c0_123 = arith.constant 0 : index
    %c0_124 = arith.constant 0 : index
    %167 = vector.load %arg4[%c1_121, %c0_122, %c0_123, %c0_124] : memref<2x2x1x16xf32, #tpu.memory_space<vmem>>, vector<1x1x1x16xf32>
    %168 = vector.shape_cast %167 : vector<1x1x1x16xf32> to vector<1x16xf32>
    %169 = vector.broadcast %168 : vector<1x16xf32> to vector<16x16xf32>
    %170 = arith.addf %166, %169 : vector<16x16xf32>
    %c1_125 = arith.constant 1 : index
    %c0_126 = arith.constant 0 : index
    %c0_127 = arith.constant 0 : index
    %c0_128 = arith.constant 0 : index
    %171 = vector.load %arg2[%c1_125, %c0_126, %c0_127, %c0_128] : memref<2x2x32x16xf32, #tpu.memory_space<vmem>>, vector<1x1x32x16xf32>
    %172 = vector.shape_cast %171 : vector<1x1x32x16xf32> to vector<32x16xf32>
    %cst_129 = arith.constant dense<0.000000e+00> : vector<16x16xf32>
    %173 = tpu.matmul %162, %172, %cst_129 {dimension_numbers = #tpu.dot_dimension_numbers<[1], [0], [0], [1], [0, 0, 1, 1], [], []>} : vector<16x32xf32>, vector<32x16xf32>, vector<16x16xf32> -> vector<16x16xf32>
    %c1_130 = arith.constant 1 : index
    %c0_131 = arith.constant 0 : index
    %c0_132 = arith.constant 0 : index
    %c0_133 = arith.constant 0 : index
    %174 = vector.load %arg5[%c1_130, %c0_131, %c0_132, %c0_133] : memref<2x2x1x16xf32, #tpu.memory_space<vmem>>, vector<1x1x1x16xf32>
    %175 = vector.shape_cast %174 : vector<1x1x1x16xf32> to vector<1x16xf32>
    %176 = vector.broadcast %175 : vector<1x16xf32> to vector<16x16xf32>
    %177 = arith.addf %173, %176 : vector<16x16xf32>
    %c1_134 = arith.constant 1 : index
    %c0_135 = arith.constant 0 : index
    %c0_136 = arith.constant 0 : index
    %c0_137 = arith.constant 0 : index
    %178 = vector.load %arg3[%c1_134, %c0_135, %c0_136, %c0_137] : memref<2x2x32x16xf32, #tpu.memory_space<vmem>>, vector<1x1x32x16xf32>
    %179 = vector.shape_cast %178 : vector<1x1x32x16xf32> to vector<32x16xf32>
    %cst_138 = arith.constant dense<0.000000e+00> : vector<16x16xf32>
    %180 = tpu.matmul %162, %179, %cst_138 {dimension_numbers = #tpu.dot_dimension_numbers<[1], [0], [0], [1], [0, 0, 1, 1], [], []>} : vector<16x32xf32>, vector<32x16xf32>, vector<16x16xf32> -> vector<16x16xf32>
    %c1_139 = arith.constant 1 : index
    %c0_140 = arith.constant 0 : index
    %c0_141 = arith.constant 0 : index
    %c0_142 = arith.constant 0 : index
    %181 = vector.load %arg6[%c1_139, %c0_140, %c0_141, %c0_142] : memref<2x2x1x16xf32, #tpu.memory_space<vmem>>, vector<1x1x1x16xf32>
    %182 = vector.shape_cast %181 : vector<1x1x1x16xf32> to vector<1x16xf32>
    %183 = vector.broadcast %182 : vector<1x16xf32> to vector<16x16xf32>
    %184 = arith.addf %180, %183 : vector<16x16xf32>
    %185 = vector.shape_cast %170 : vector<16x16xf32> to vector<2x8x16xf32>
    %186 = vector.shape_cast %177 : vector<16x16xf32> to vector<2x8x16xf32>
    %187 = vector.shape_cast %184 : vector<16x16xf32> to vector<2x8x16xf32>
    "tpu.trace_start"() <{level = 10 : i32, message = "bqd,bkd->bqk"}> : () -> ()
    %cst_143 = arith.constant dense<0.000000e+00> : vector<2x8x8xf32>
    %188 = tpu.matmul %185, %186, %cst_143 {dimension_numbers = #tpu.dot_dimension_numbers<[2], [2], [1], [1], [0, 0, 0, 1, 1, 1], [0], [0]>} : vector<2x8x16xf32>, vector<2x8x16xf32>, vector<2x8x8xf32> -> vector<2x8x8xf32>
    "tpu.trace_stop"() : () -> ()
    %cst_144 = arith.constant 2.500000e-01 : f32
    %189 = vector.broadcast %cst_144 : f32 to vector<2x8x8xf32>
    %190 = arith.mulf %188, %189 : vector<2x8x8xf32>
    %cst_145 = arith.constant dense<0xFF800000> : vector<2x8xf32>
    %191 = vector.multi_reduction <maximumf>, %190, %cst_145 [2] : vector<2x8x8xf32> to vector<2x8xf32>
    %192 = vector.shape_cast %191 : vector<2x8xf32> to vector<2x8x1xf32>
    %193 = vector.broadcast %192 : vector<2x8x1xf32> to vector<2x8x8xf32>
    %194 = arith.subf %190, %193 : vector<2x8x8xf32>
    %195 = math.exp %194 : vector<2x8x8xf32>
    %cst_146 = arith.constant dense<0.000000e+00> : vector<2x8xf32>
    %196 = vector.multi_reduction <add>, %195, %cst_146 [2] : vector<2x8x8xf32> to vector<2x8xf32>
    %197 = vector.shape_cast %196 : vector<2x8xf32> to vector<2x8x1xf32>
    %198 = tpu.reciprocal %197 {approx = true} : vector<2x8x1xf32> -> vector<2x8x1xf32>
    %199 = vector.broadcast %198 : vector<2x8x1xf32> to vector<2x8x8xf32>
    %200 = arith.mulf %195, %199 : vector<2x8x8xf32>
    "tpu.trace_start"() <{level = 10 : i32, message = "bqk,bkd->bqd"}> : () -> ()
    %cst_147 = arith.constant dense<0.000000e+00> : vector<2x8x16xf32>
    %201 = tpu.matmul %200, %187, %cst_147 {dimension_numbers = #tpu.dot_dimension_numbers<[2], [1], [1], [2], [0, 0, 0, 1, 1, 2], [0], [0]>} : vector<2x8x8xf32>, vector<2x8x16xf32>, vector<2x8x16xf32> -> vector<2x8x16xf32>
    "tpu.trace_stop"() : () -> ()
    %202 = vector.shape_cast %201 : vector<2x8x16xf32> to vector<16x16xf32>
    %c1_148 = arith.constant 1 : index
    %c0_149 = arith.constant 0 : index
    %c0_150 = arith.constant 0 : index
    %c0_151 = arith.constant 0 : index
    %203 = vector.load %arg7[%c1_148, %c0_149, %c0_150, %c0_151] : memref<2x2x16x32xf32, #tpu.memory_space<vmem>>, vector<1x1x16x32xf32>
    %204 = vector.shape_cast %203 : vector<1x1x16x32xf32> to vector<16x32xf32>
    %cst_152 = arith.constant dense<0.000000e+00> : vector<16x32xf32>
    %205 = tpu.matmul %202, %204, %cst_152 {dimension_numbers = #tpu.dot_dimension_numbers<[1], [0], [0], [1], [0, 0, 1, 1], [], []>} : vector<16x16xf32>, vector<16x32xf32>, vector<16x32xf32> -> vector<16x32xf32>
    %206 = arith.addf %163, %205 : vector<16x32xf32>
    %c1_153 = arith.constant 1 : index
    %c1_154 = arith.constant 1 : index
    %c0_155 = arith.constant 0 : index
    %c0_156 = arith.constant 0 : index
    %207 = vector.load %arg1[%c1_153, %c1_154, %c0_155, %c0_156] : memref<2x2x32x16xf32, #tpu.memory_space<vmem>>, vector<1x1x32x16xf32>
    %208 = vector.shape_cast %207 : vector<1x1x32x16xf32> to vector<32x16xf32>
    %cst_157 = arith.constant dense<0.000000e+00> : vector<16x16xf32>
    %209 = tpu.matmul %162, %208, %cst_157 {dimension_numbers = #tpu.dot_dimension_numbers<[1], [0], [0], [1], [0, 0, 1, 1], [], []>} : vector<16x32xf32>, vector<32x16xf32>, vector<16x16xf32> -> vector<16x16xf32>
    %c1_158 = arith.constant 1 : index
    %c1_159 = arith.constant 1 : index
    %c0_160 = arith.constant 0 : index
    %c0_161 = arith.constant 0 : index
    %210 = vector.load %arg4[%c1_158, %c1_159, %c0_160, %c0_161] : memref<2x2x1x16xf32, #tpu.memory_space<vmem>>, vector<1x1x1x16xf32>
    %211 = vector.shape_cast %210 : vector<1x1x1x16xf32> to vector<1x16xf32>
    %212 = vector.broadcast %211 : vector<1x16xf32> to vector<16x16xf32>
    %213 = arith.addf %209, %212 : vector<16x16xf32>
    %c1_162 = arith.constant 1 : index
    %c1_163 = arith.constant 1 : index
    %c0_164 = arith.constant 0 : index
    %c0_165 = arith.constant 0 : index
    %214 = vector.load %arg2[%c1_162, %c1_163, %c0_164, %c0_165] : memref<2x2x32x16xf32, #tpu.memory_space<vmem>>, vector<1x1x32x16xf32>
    %215 = vector.shape_cast %214 : vector<1x1x32x16xf32> to vector<32x16xf32>
    %cst_166 = arith.constant dense<0.000000e+00> : vector<16x16xf32>
    %216 = tpu.matmul %162, %215, %cst_166 {dimension_numbers = #tpu.dot_dimension_numbers<[1], [0], [0], [1], [0, 0, 1, 1], [], []>} : vector<16x32xf32>, vector<32x16xf32>, vector<16x16xf32> -> vector<16x16xf32>
    %c1_167 = arith.constant 1 : index
    %c1_168 = arith.constant 1 : index
    %c0_169 = arith.constant 0 : index
    %c0_170 = arith.constant 0 : index
    %217 = vector.load %arg5[%c1_167, %c1_168, %c0_169, %c0_170] : memref<2x2x1x16xf32, #tpu.memory_space<vmem>>, vector<1x1x1x16xf32>
    %218 = vector.shape_cast %217 : vector<1x1x1x16xf32> to vector<1x16xf32>
    %219 = vector.broadcast %218 : vector<1x16xf32> to vector<16x16xf32>
    %220 = arith.addf %216, %219 : vector<16x16xf32>
    %c1_171 = arith.constant 1 : index
    %c1_172 = arith.constant 1 : index
    %c0_173 = arith.constant 0 : index
    %c0_174 = arith.constant 0 : index
    %221 = vector.load %arg3[%c1_171, %c1_172, %c0_173, %c0_174] : memref<2x2x32x16xf32, #tpu.memory_space<vmem>>, vector<1x1x32x16xf32>
    %222 = vector.shape_cast %221 : vector<1x1x32x16xf32> to vector<32x16xf32>
    %cst_175 = arith.constant dense<0.000000e+00> : vector<16x16xf32>
    %223 = tpu.matmul %162, %222, %cst_175 {dimension_numbers = #tpu.dot_dimension_numbers<[1], [0], [0], [1], [0, 0, 1, 1], [], []>} : vector<16x32xf32>, vector<32x16xf32>, vector<16x16xf32> -> vector<16x16xf32>
    %c1_176 = arith.constant 1 : index
    %c1_177 = arith.constant 1 : index
    %c0_178 = arith.constant 0 : index
    %c0_179 = arith.constant 0 : index
    %224 = vector.load %arg6[%c1_176, %c1_177, %c0_178, %c0_179] : memref<2x2x1x16xf32, #tpu.memory_space<vmem>>, vector<1x1x1x16xf32>
    %225 = vector.shape_cast %224 : vector<1x1x1x16xf32> to vector<1x16xf32>
    %226 = vector.broadcast %225 : vector<1x16xf32> to vector<16x16xf32>
    %227 = arith.addf %223, %226 : vector<16x16xf32>
    %228 = vector.shape_cast %213 : vector<16x16xf32> to vector<2x8x16xf32>
    %229 = vector.shape_cast %220 : vector<16x16xf32> to vector<2x8x16xf32>
    %230 = vector.shape_cast %227 : vector<16x16xf32> to vector<2x8x16xf32>
    "tpu.trace_start"() <{level = 10 : i32, message = "bqd,bkd->bqk"}> : () -> ()
    %cst_180 = arith.constant dense<0.000000e+00> : vector<2x8x8xf32>
    %231 = tpu.matmul %228, %229, %cst_180 {dimension_numbers = #tpu.dot_dimension_numbers<[2], [2], [1], [1], [0, 0, 0, 1, 1, 1], [0], [0]>} : vector<2x8x16xf32>, vector<2x8x16xf32>, vector<2x8x8xf32> -> vector<2x8x8xf32>
    "tpu.trace_stop"() : () -> ()
    %cst_181 = arith.constant 2.500000e-01 : f32
    %232 = vector.broadcast %cst_181 : f32 to vector<2x8x8xf32>
    %233 = arith.mulf %231, %232 : vector<2x8x8xf32>
    %cst_182 = arith.constant dense<0xFF800000> : vector<2x8xf32>
    %234 = vector.multi_reduction <maximumf>, %233, %cst_182 [2] : vector<2x8x8xf32> to vector<2x8xf32>
    %235 = vector.shape_cast %234 : vector<2x8xf32> to vector<2x8x1xf32>
    %236 = vector.broadcast %235 : vector<2x8x1xf32> to vector<2x8x8xf32>
    %237 = arith.subf %233, %236 : vector<2x8x8xf32>
    %238 = math.exp %237 : vector<2x8x8xf32>
    %cst_183 = arith.constant dense<0.000000e+00> : vector<2x8xf32>
    %239 = vector.multi_reduction <add>, %238, %cst_183 [2] : vector<2x8x8xf32> to vector<2x8xf32>
    %240 = vector.shape_cast %239 : vector<2x8xf32> to vector<2x8x1xf32>
    %241 = tpu.reciprocal %240 {approx = true} : vector<2x8x1xf32> -> vector<2x8x1xf32>
    %242 = vector.broadcast %241 : vector<2x8x1xf32> to vector<2x8x8xf32>
    %243 = arith.mulf %238, %242 : vector<2x8x8xf32>
    "tpu.trace_start"() <{level = 10 : i32, message = "bqk,bkd->bqd"}> : () -> ()
    %cst_184 = arith.constant dense<0.000000e+00> : vector<2x8x16xf32>
    %244 = tpu.matmul %243, %230, %cst_184 {dimension_numbers = #tpu.dot_dimension_numbers<[2], [1], [1], [2], [0, 0, 0, 1, 1, 2], [0], [0]>} : vector<2x8x8xf32>, vector<2x8x16xf32>, vector<2x8x16xf32> -> vector<2x8x16xf32>
    "tpu.trace_stop"() : () -> ()
    %245 = vector.shape_cast %244 : vector<2x8x16xf32> to vector<16x16xf32>
    %c1_185 = arith.constant 1 : index
    %c1_186 = arith.constant 1 : index
    %c0_187 = arith.constant 0 : index
    %c0_188 = arith.constant 0 : index
    %246 = vector.load %arg7[%c1_185, %c1_186, %c0_187, %c0_188] : memref<2x2x16x32xf32, #tpu.memory_space<vmem>>, vector<1x1x16x32xf32>
    %247 = vector.shape_cast %246 : vector<1x1x16x32xf32> to vector<16x32xf32>
    %cst_189 = arith.constant dense<0.000000e+00> : vector<16x32xf32>
    %248 = tpu.matmul %245, %247, %cst_189 {dimension_numbers = #tpu.dot_dimension_numbers<[1], [0], [0], [1], [0, 0, 1, 1], [], []>} : vector<16x16xf32>, vector<16x32xf32>, vector<16x32xf32> -> vector<16x32xf32>
    %249 = arith.addf %206, %248 : vector<16x32xf32>
    %c1_190 = arith.constant 1 : index
    %c0_191 = arith.constant 0 : index
    %c0_192 = arith.constant 0 : index
    %250 = vector.load %arg8[%c1_190, %c0_191, %c0_192] : memref<2x1x32xf32, #tpu.memory_space<vmem>>, vector<1x1x32xf32>
    %251 = vector.shape_cast %250 : vector<1x1x32xf32> to vector<1x32xf32>
    %252 = vector.broadcast %251 : vector<1x32xf32> to vector<16x32xf32>
    %253 = arith.addf %249, %252 : vector<16x32xf32>
    %254 = arith.addf %162, %253 : vector<16x32xf32>
    %c1_193 = arith.constant 1 : index
    %c0_194 = arith.constant 0 : index
    %c0_195 = arith.constant 0 : index
    %255 = vector.load %arg9[%c1_193, %c0_194, %c0_195] : memref<2x1x32xf32, #tpu.memory_space<vmem>>, vector<1x1x32xf32>
    %256 = vector.shape_cast %255 : vector<1x1x32xf32> to vector<1x32xf32>
    %c1_196 = arith.constant 1 : index
    %c0_197 = arith.constant 0 : index
    %c0_198 = arith.constant 0 : index
    %257 = vector.load %arg10[%c1_196, %c0_197, %c0_198] : memref<2x1x32xf32, #tpu.memory_space<vmem>>, vector<1x1x32xf32>
    %258 = vector.shape_cast %257 : vector<1x1x32xf32> to vector<1x32xf32>
    %cst_199 = arith.constant dense<0.000000e+00> : vector<16xf32>
    %259 = vector.multi_reduction <add>, %254, %cst_199 [1] : vector<16x32xf32> to vector<16xf32>
    %260 = vector.shape_cast %259 : vector<16xf32> to vector<16x1xf32>
    %cst_200 = arith.constant 3.200000e+01 : f32
    %261 = vector.broadcast %cst_200 : f32 to vector<16x1xf32>
    %262 = arith.divf %260, %261 : vector<16x1xf32>
    %263 = vector.broadcast %262 : vector<16x1xf32> to vector<16x32xf32>
    %264 = arith.subf %254, %263 : vector<16x32xf32>
    %265 = arith.mulf %264, %264 : vector<16x32xf32>
    %cst_201 = arith.constant dense<0.000000e+00> : vector<16xf32>
    %266 = vector.multi_reduction <add>, %265, %cst_201 [1] : vector<16x32xf32> to vector<16xf32>
    %267 = vector.shape_cast %266 : vector<16xf32> to vector<16x1xf32>
    %cst_202 = arith.constant 3.200000e+01 : f32
    %268 = vector.broadcast %cst_202 : f32 to vector<16x1xf32>
    %269 = arith.divf %267, %268 : vector<16x1xf32>
    %270 = vector.broadcast %262 : vector<16x1xf32> to vector<16x32xf32>
    %271 = arith.subf %254, %270 : vector<16x32xf32>
    %cst_203 = arith.constant 9.99999974E-6 : f32
    %272 = vector.broadcast %cst_203 : f32 to vector<16x1xf32>
    %273 = arith.addf %269, %272 : vector<16x1xf32>
    %274 = math.rsqrt %273 : vector<16x1xf32>
    %275 = vector.broadcast %274 : vector<16x1xf32> to vector<16x32xf32>
    %276 = arith.mulf %271, %275 : vector<16x32xf32>
    %277 = vector.broadcast %256 : vector<1x32xf32> to vector<16x32xf32>
    %278 = arith.mulf %276, %277 : vector<16x32xf32>
    %279 = vector.broadcast %258 : vector<1x32xf32> to vector<16x32xf32>
    %280 = arith.addf %278, %279 : vector<16x32xf32>
    %c1_204 = arith.constant 1 : index
    %c0_205 = arith.constant 0 : index
    %c0_206 = arith.constant 0 : index
    %281 = vector.load %arg11[%c1_204, %c0_205, %c0_206] : memref<2x32x32xf32, #tpu.memory_space<vmem>>, vector<1x32x32xf32>
    %282 = vector.shape_cast %281 : vector<1x32x32xf32> to vector<32x32xf32>
    %cst_207 = arith.constant dense<0.000000e+00> : vector<16x32xf32>
    %283 = tpu.matmul %280, %282, %cst_207 {dimension_numbers = #tpu.dot_dimension_numbers<[1], [0], [0], [1], [0, 0, 1, 1], [], []>} : vector<16x32xf32>, vector<32x32xf32>, vector<16x32xf32> -> vector<16x32xf32>
    %c1_208 = arith.constant 1 : index
    %c0_209 = arith.constant 0 : index
    %c0_210 = arith.constant 0 : index
    %284 = vector.load %arg12[%c1_208, %c0_209, %c0_210] : memref<2x1x32xf32, #tpu.memory_space<vmem>>, vector<1x1x32xf32>
    %285 = vector.shape_cast %284 : vector<1x1x32xf32> to vector<1x32xf32>
    %286 = vector.broadcast %285 : vector<1x32xf32> to vector<16x32xf32>
    %287 = arith.addf %283, %286 : vector<16x32xf32>
    %cst_211 = arith.constant 0.000000e+00 : f32
    %288 = vector.broadcast %cst_211 : f32 to vector<16x32xf32>
    %289 = arith.maximumf %287, %288 : vector<16x32xf32>
    %c1_212 = arith.constant 1 : index
    %c0_213 = arith.constant 0 : index
    %c0_214 = arith.constant 0 : index
    %290 = vector.load %arg13[%c1_212, %c0_213, %c0_214] : memref<2x32x32xf32, #tpu.memory_space<vmem>>, vector<1x32x32xf32>
    %291 = vector.shape_cast %290 : vector<1x32x32xf32> to vector<32x32xf32>
    %cst_215 = arith.constant dense<0.000000e+00> : vector<16x32xf32>
    %292 = tpu.matmul %289, %291, %cst_215 {dimension_numbers = #tpu.dot_dimension_numbers<[1], [0], [0], [1], [0, 0, 1, 1], [], []>} : vector<16x32xf32>, vector<32x32xf32>, vector<16x32xf32> -> vector<16x32xf32>
    %c1_216 = arith.constant 1 : index
    %c0_217 = arith.constant 0 : index
    %c0_218 = arith.constant 0 : index
    %293 = vector.load %arg14[%c1_216, %c0_217, %c0_218] : memref<2x1x32xf32, #tpu.memory_space<vmem>>, vector<1x1x32xf32>
    %294 = vector.shape_cast %293 : vector<1x1x32xf32> to vector<1x32xf32>
    %295 = vector.broadcast %294 : vector<1x32xf32> to vector<16x32xf32>
    %296 = arith.addf %292, %295 : vector<16x32xf32>
    %297 = arith.addf %280, %296 : vector<16x32xf32>
    %c1_219 = arith.constant 1 : index
    %c0_220 = arith.constant 0 : index
    %c0_221 = arith.constant 0 : index
    %298 = vector.load %arg15[%c1_219, %c0_220, %c0_221] : memref<2x1x32xf32, #tpu.memory_space<vmem>>, vector<1x1x32xf32>
    %299 = vector.shape_cast %298 : vector<1x1x32xf32> to vector<1x32xf32>
    %c1_222 = arith.constant 1 : index
    %c0_223 = arith.constant 0 : index
    %c0_224 = arith.constant 0 : index
    %300 = vector.load %arg16[%c1_222, %c0_223, %c0_224] : memref<2x1x32xf32, #tpu.memory_space<vmem>>, vector<1x1x32xf32>
    %301 = vector.shape_cast %300 : vector<1x1x32xf32> to vector<1x32xf32>
    %cst_225 = arith.constant dense<0.000000e+00> : vector<16xf32>
    %302 = vector.multi_reduction <add>, %297, %cst_225 [1] : vector<16x32xf32> to vector<16xf32>
    %303 = vector.shape_cast %302 : vector<16xf32> to vector<16x1xf32>
    %cst_226 = arith.constant 3.200000e+01 : f32
    %304 = vector.broadcast %cst_226 : f32 to vector<16x1xf32>
    %305 = arith.divf %303, %304 : vector<16x1xf32>
    %306 = vector.broadcast %305 : vector<16x1xf32> to vector<16x32xf32>
    %307 = arith.subf %297, %306 : vector<16x32xf32>
    %308 = arith.mulf %307, %307 : vector<16x32xf32>
    %cst_227 = arith.constant dense<0.000000e+00> : vector<16xf32>
    %309 = vector.multi_reduction <add>, %308, %cst_227 [1] : vector<16x32xf32> to vector<16xf32>
    %310 = vector.shape_cast %309 : vector<16xf32> to vector<16x1xf32>
    %cst_228 = arith.constant 3.200000e+01 : f32
    %311 = vector.broadcast %cst_228 : f32 to vector<16x1xf32>
    %312 = arith.divf %310, %311 : vector<16x1xf32>
    %313 = vector.broadcast %305 : vector<16x1xf32> to vector<16x32xf32>
    %314 = arith.subf %297, %313 : vector<16x32xf32>
    %cst_229 = arith.constant 9.99999974E-6 : f32
    %315 = vector.broadcast %cst_229 : f32 to vector<16x1xf32>
    %316 = arith.addf %312, %315 : vector<16x1xf32>
    %317 = math.rsqrt %316 : vector<16x1xf32>
    %318 = vector.broadcast %317 : vector<16x1xf32> to vector<16x32xf32>
    %319 = arith.mulf %314, %318 : vector<16x32xf32>
    %320 = vector.broadcast %299 : vector<1x32xf32> to vector<16x32xf32>
    %321 = arith.mulf %319, %320 : vector<16x32xf32>
    %322 = vector.broadcast %301 : vector<1x32xf32> to vector<16x32xf32>
    %323 = arith.addf %321, %322 : vector<16x32xf32>
    %324 = vector.shape_cast %323 : vector<16x32xf32> to vector<2x8x32xf32>
    %325 = vector.extract_strided_slice %324 {offsets = [0, 7, 0], sizes = [2, 1, 32], strides = [1, 1, 1]} : vector<2x8x32xf32> to vector<2x1x32xf32>
    %326 = vector.shape_cast %325 : vector<2x1x32xf32> to vector<2x32xf32>
    %c0_230 = arith.constant 0 : index
    %c0_231 = arith.constant 0 : index
    %327 = vector.load %arg17[%c0_230, %c0_231] : memref<32x4xf32, #tpu.memory_space<vmem>>, vector<32x4xf32>
    %cst_232 = arith.constant dense<0.000000e+00> : vector<2x4xf32>
    %328 = tpu.matmul %326, %327, %cst_232 {dimension_numbers = #tpu.dot_dimension_numbers<[1], [0], [0], [1], [0, 0, 1, 1], [], []>} : vector<2x32xf32>, vector<32x4xf32>, vector<2x4xf32> -> vector<2x4xf32>
    %c0_233 = arith.constant 0 : index
    %c0_234 = arith.constant 0 : index
    %329 = vector.load %arg18[%c0_233, %c0_234] : memref<1x4xf32, #tpu.memory_space<vmem>>, vector<1x4xf32>
    %330 = vector.broadcast %329 : vector<1x4xf32> to vector<2x4xf32>
    %331 = arith.addf %328, %330 : vector<2x4xf32>
    %c0_235 = arith.constant 0 : index
    %c0_236 = arith.constant 0 : index
    %332 = vector.load %arg19[%c0_235, %c0_236] : memref<2x4xf32, #tpu.memory_space<vmem>>, vector<2x4xf32>
    tpu.vector_store %arg19[%c0_235, %c0_236], %331 {strides = array<i32>} : memref<2x4xf32, #tpu.memory_space<vmem>>, vector<2x4xf32>,
    return
  }
}

</mosaic_0001>

<bundles_post_ra>
// kernel: tpu_custom_call.1
= control target key start
LH: loop header
LB: loop body
LE: loop exit
PB: predicated region body
PF: predicated region fallthrough
CT: control target
= control target key end

     0   :  { %s4737_s0 = inlined_call_operand.vmem [shape: f32[2,8,32], index: 0, kind: input, shape index: {}]   ;;  %s4738_s1 = inlined_call_operand.vmem [shape: f32[2,2,32,16], index: 1, kind: input, shape index: {}]   ;;  %s4739_s2 = inlined_call_operand.vmem [shape: f32[2,2,32,16], index: 2, kind: input, shape index: {}]   ;;  %s4740_s3 = inlined_call_operand.vmem [shape: f32[2,2,32,16], index: 3, kind: input, shape index: {}]   ;;  %s4741_s4 = inlined_call_operand.vmem [shape: f32[2,2,1,16], index: 4, kind: input, shape index: {}]   ;;  %s4742_s5 = inlined_call_operand.vmem [shape: f32[2,2,1,16], index: 5, kind: input, shape index: {}]   ;;  %s4743_s6 = inlined_call_operand.vmem [shape: f32[2,2,1,16], index: 6, kind: input, shape index: {}]   ;;  %s4744_s7 = inlined_call_operand.vmem [shape: f32[2,2,16,32], index: 7, kind: input, shape index: {}]   ;;  %s4745_s8 = inlined_call_operand.vmem [shape: f32[2,1,32], index: 8, kind: input, shape index: {}]   ;;  %s4746_s9 = inlined_call_operand.vmem [shape: f32[2,1,32], index: 9, kind: input, shape index: {}]   ;;  %s4747_s10 = inlined_call_operand.vmem [shape: f32[2,1,32], index: 10, kind: input, shape index: {}]   ;;  %s4748_s11 = inlined_call_operand.vmem [shape: f32[2,32,32], index: 11, kind: input, shape index: {}]   ;;  %s4749_s12 = inlined_call_operand.vmem [shape: f32[2,1,32], index: 12, kind: input, shape index: {}]   ;;  %s4750_s13 = inlined_call_operand.vmem [shape: f32[2,32,32], index: 13, kind: input, shape index: {}]   ;;  %s4751_s14 = inlined_call_operand.vmem [shape: f32[2,1,32], index: 14, kind: input, shape index: {}]   ;;  %s4752_s15 = inlined_call_operand.vmem [shape: f32[2,1,32], index: 15, kind: input, shape index: {}]   ;;  %s4753_s16 = inlined_call_operand.vmem [shape: f32[2,1,32], index: 16, kind: input, shape index: {}]   ;;  %s4754_s17 = inlined_call_operand.vmem [shape: f32[32,4], index: 17, kind: input, shape index: {}]   ;;  %s4755_s18 = inlined_call_operand.vmem [shape: f32[1,4], index: 18, kind: input, shape index: {}]   ;;  %s4756_s19 = inlined_call_operand.hbm [shape: f32[2,4], index: 19, kind: output, shape index: {}]  }
   0x1   :  { %4762 = sst [smem:[#allocation5_spill]] %s4737_s0 }
   0x2   :  { %4763 = sst [smem:[#allocation6_spill]] %s4738_s1 }
   0x3   :  { %4764 = sst [smem:[#allocation7_spill]] %s4739_s2 }
   0x4   :  { %4765 = sst [smem:[#allocation8_spill]] %s4740_s3 }
   0x5   :  { %4766 = sst [smem:[#allocation9_spill]] %s4751_s14 }
   0x6   :  { %s4767_s20 = sld [smem:[#allocation7_spill]] }
   0x7   :  { %s4768_s14 = sld [smem:[#allocation6_spill]] }
   0xc   :  { %v161_v0 = vld [vmem:[%s4767_s20 + $0x18] sm:$0xff]  ;;  %v160_v2 = vld [vmem:[%s4767_s20 + $0x10] sm:$0xff]  ;;  %v159_v4 = vld [vmem:[%s4767_s20 + $0x8] sm:$0xff] }
   0xd   :  { %v68_v1 = vld [vmem:[%s4768_s14 + $0x18] sm:$0xff]  ;;  %3760 = vmatprep.subr.mxu1 %v161_v0  ;;  %v67_v3 = vld [vmem:[%s4768_s14 + $0x10] sm:$0xff]  ;;  %v66_v5 = vld [vmem:[%s4768_s14 + $0x8] sm:$0xff] }
   0xe   :  { %3749 = vmatprep.subr.mxu0 %v68_v1  ;;  %3761 = vmatpush3.msra.mxu1 %v161_v0 }
   0xf   :  { %3750 = vmatpush3.msra.mxu0 %v68_v1  ;;  %3762 = vmatprep.subr.mxu1 %v160_v2 }
  0x10   :  { %3751 = vmatprep.subr.mxu0 %v67_v3 }
  0x11   :  { %24 = vsyncpa [#allocation3], 0  ;;  %3763 = vmatpush3.msra.mxu1 %v160_v2  ;;  %3752 = vmatpush3.msra.mxu0 %v67_v3  ;;  %v158_v6 = vld [vmem:[%s4767_s20] sm:$0xff]  ;;  %s4769_s22 = sld [smem:[#allocation5_spill]]  ;;  %vm76_vm0 = vcmask 261120   ;;  %v4117_v10 = vmov 0.0  }
  0x12   :  { %v65_v7 = vld [vmem:[%s4768_s14] sm:$0xff]  ;;  %3764 = vmatprep.subr.mxu1 %v159_v4  ;;  %3753 = vmatprep.subr.mxu0 %v66_v5  ;;  %vm4118_vm1 = vmmov 0   ;;  %vm330_vm2 = vcmask 130048   ;;  %s4770_s29 = sld [smem:[#allocation8_spill]]  ;;  %vm485_vm3 = vcmask 64512   ;;  %v3460_v48 = vld [vmem:[%s4768_s14 + $0x38] sm:$0xff] }
  0x13   :  { %3765 = vmatpush3.msra.mxu1 %v159_v4  ;;  %3754 = vmatpush3.msra.mxu0 %v66_v5  ;;  %v3445_v13 = vld [vmem:[%s4742_s5] ss:$0 sm:$0xff]  ;;  %v3459_v49 = vld [vmem:[%s4768_s14 + $0x30] sm:$0xff]  ;;  %v3458_v50 = vld [vmem:[%s4768_s14 + $0x28] sm:$0xff]  ;;  %s4771_s24 = sld [smem:[#allocation9_spill]]  ;;  %vm3352_vm4 = vcmask 1041409  }
  0x14   :  { %3766 = vmatprep.subr.mxu1 %v158_v6  ;;  %3755 = vmatprep.subr.mxu0 %v65_v7  ;;  %v3442_v15 = vld [vmem:[%s4741_s4] ss:$0 sm:$0xff]  ;;  %v3468_v56 = vld [vmem:[%s4767_s20 + $0x38] sm:$0xff]  ;;  %v3467_v59 = vld [vmem:[%s4767_s20 + $0x30] sm:$0xff]  ;;  %vm3426_vm5 = vcmask 25600  }
  0x15   :  { %3767 = vmatpush3.msra.mxu1 %v158_v6  ;;  %3756 = vmatpush3.msra.mxu0 %v65_v7  ;;  %v3448_v44 = vld [vmem:[%s4743_s6] ss:$0 sm:$0xff]  ;;  %v3466_v60 = vld [vmem:[%s4767_s20 + $0x28] sm:$0xff]  ;;  %v3470_v4 = vld [vmem:[%s4742_s5 + $0x1] ss:$0 sm:$0xff] }
  0x16   :  { %3782 = vmatprep.subr.mxu1 %v4117_v10  ;;  %v3457_v51 = vld [vmem:[%s4768_s14 + $0x20] sm:$0xff] }
  0x17   :  { %v4247_v8 = vld [vmem:[%s4769_s22] sm:$0xff]  ;;  %v4252_v9 = vld [vmem:[%s4769_s22 + $0x8] sm:$0xff] }
  0x18   :  { %3768 = vmatprep.mubr.msk.f32.mxu1 %vm76_vm0, %v4247_v8  ;;  %3757 = vmatprep.mubr.msk.f32.mxu0 %vm76_vm0, %v4247_v8  ;;  %v247_v21 = vld [vmem:[%s4770_s29 + $0x18] sm:$0xff]  ;;  %v246_v22 = vld [vmem:[%s4770_s29 + $0x10] sm:$0xff]  ;;  %v245_v23 = vld [vmem:[%s4770_s29 + $0x8] sm:$0xff] }
  0x19   :  { %3769 = vmatmul.mubr.msk.f32.vlgmr.msra.gmra.mxu1 %vm76_vm0, %v4252_v9  ;;  %3758 = vmatmul.mubr.msk.f32.vlgmr.msra.gmra.mxu0 %vm76_vm0, %v4252_v9  ;;  %v244_v24 = vld [vmem:[%s4770_s29] sm:$0xff] }
  0x1a   :  { %3779 = vmatprep.mubr.msk.f32.mxu0 %vm76_vm0, %v4247_v8  ;;  %3784 = vmatprep.mubr.msk.f32.mxu1 %vm4118_vm1, %v4117_v10  ;;  %v3465_v61 = vld [vmem:[%s4767_s20 + $0x20] sm:$0xff] }
  0x1b   :  { %3771 = vmatprep.subr.mxu0 %v247_v21  ;;  %v3462_v6 = vld [vmem:[%s4741_s4 + $0x1] ss:$0 sm:$0xff] }
  0x1c   :  { %3772 = vmatpush3.msra.mxu0 %v247_v21 }
  0x1d   :  { %3773 = vmatprep.subr.mxu0 %v246_v22 }
  0x1e   :  { %3774 = vmatpush3.msra.mxu0 %v246_v22 }
  0x1f   :  { %3775 = vmatprep.subr.mxu0 %v245_v23 }
  0x20   :  { %3776 = vmatpush3.msra.mxu0 %v245_v23 }
  0x21   :  { %3777 = vmatprep.subr.mxu0 %v244_v24 }
  0x22   :  { %3778 = vmatpush3.msra.mxu0 %v244_v24 }
  0x23   :  { %3780 = vmatmul.mubr.msk.f32.vlgmr.msra.gmra.mxu0 %vm76_vm0, %v4252_v9  ;;  %3802 = vmatprep.subr.mxu0 %v3460_v48 }
  0x24   :  { %3810 = vmatprep.mubr.msk.f32.mxu0 %vm76_vm0, %v4247_v8  ;;  %3803 = vmatpush3.msra.mxu0 %v3460_v48 }
  0x25   :  { %3804 = vmatprep.subr.mxu0 %v3459_v49 }
  0x26   :  { %3805 = vmatpush3.msra.mxu0 %v3459_v49  ;;  %v654_v49 = vld [vmem:[%s4744_s7] sm:$0xff] }
  0x27   :  { %3806 = vmatprep.subr.mxu0 %v3458_v50 }
  0x28   :  { %3807 = vmatpush3.msra.mxu0 %v3458_v50  ;;  %v3488_v50 = vld [vmem:[%s4744_s7 + $0x18] sm:$0xff] }
  0x29   :  { %3808 = vmatprep.subr.mxu0 %v3457_v51 }
  0x2a   :  { %3809 = vmatpush3.msra.mxu0 %v3457_v51  ;;  %v3487_v51 = vld [vmem:[%s4744_s7 + $0x10] sm:$0xff] }
  0x2b   :  { %3811 = vmatmul.mubr.msk.f32.vlgmr.msra.gmra.mxu0 %vm76_vm0, %v4252_v9 }
  0x2c   :  { %3832 = vmatprep.mubr.msk.f32.mxu0 %vm76_vm0, %v4247_v8 }
  0xd9   :  { %v3770_v11 = vpop.f32.mrf.mxu1  ;;  %v3759_v12 = vpop.f32.mrf.mxu0 }
  0xda   :  { %v241_v19 = vadd.f32 %v3770_v11, %v3445_v13  ;;  %v155_v20 = vadd.f32 %v3759_v12, %v3442_v15 }
  0xdb   :  { %v235_v14 = vpop.f32.mrf.mxu1  ;;  %v149_v17 = vpop.f32.mrf.mxu0 }
  0xdc   :  { %v236_v16 = vadd.f32 %v3445_v13, %v235_v14  ;;  %v150_v18 = vadd.f32 %v3442_v15, %v149_v17  ;;  %v3476_v15 = vld [vmem:[%s4770_s29 + $0x38] sm:$0xff]  ;;  %v3474_v17 = vld [vmem:[%s4770_s29 + $0x28] sm:$0xff] }
  0xdd   :  { %3824 = vmatprep.subr.mxu0 %v3476_v15 }
  0xde   :  { %3783 = vmatpush3.xpose.msk.msra.mxu1 %vm330_vm2, %v236_v16  ;;  %v3475_v16 = vld [vmem:[%s4770_s29 + $0x30] sm:$0xff]  ;;  %3825 = vmatpush3.msra.mxu0 %v3476_v15 }
  0xdf   :  { %3787 = vmatprep.subr.mxu1 %v4117_v10  ;;  %3826 = vmatprep.subr.mxu0 %v3475_v16 }
  0xe0   :  { %3827 = vmatpush3.msra.mxu0 %v3475_v16 }
  0xe1   :  { %3785 = vmatmul.mubr.msk.f32.vlgmr.msra.gmra.mxu1 %vm330_vm2, %v150_v18  ;;  %v3473_v18 = vld [vmem:[%s4770_s29 + $0x20] sm:$0xff]  ;;  %3828 = vmatprep.subr.mxu0 %v3474_v17 }
  0xe2   :  { %3788 = vmatpush3.xpose.msk.msra.mxu1 %vm330_vm2, %v241_v19  ;;  %3789 = vmatprep.mubr.msk.f32.mxu1 %vm4118_vm1, %v4117_v10 }
  0xe3   :  { %3792 = vmatprep.subr.mxu1 %v4117_v10  ;;  %v3781_v43 = vpop.f32.mrf.mxu0  ;;  %3829 = vmatpush3.msra.mxu0 %v3474_v17  ;;  %v1465_v17 = vld [vmem:[%s4748_s11 + $0x10] sm:$0xff] }
  0xe4   :  { %v327_v45 = vadd.f32 %v3781_v43, %v3448_v44  ;;  %3830 = vmatprep.subr.mxu0 %v3473_v18 }
  0xe5   :  { %3790 = vmatmul.mubr.msk.f32.vlgmr.msra.gmra.mxu1 %vm330_vm2, %v155_v20  ;;  %v321_v46 = vpop.f32.mrf.mxu0  ;;  %3831 = vmatpush3.msra.mxu0 %v3473_v18  ;;  %v1464_v18 = vld [vmem:[%s4748_s11 + $0x8] sm:$0xff] }
  0xe6   :  { %3794 = vmatprep.mubr.msk.f32.mxu1 %vm4118_vm1, %v4117_v10  ;;  %v322_v47 = vadd.f32 %v3448_v44, %v321_v46  ;;  %3833 = vmatmul.mubr.msk.f32.vlgmr.msra.gmra.mxu0 %vm76_vm0, %v4252_v9 }
  0xe7   :  { %3845 = vmatprep.subr.mxu0 %v4117_v10  ;;  %3847 = vmatprep.mubr.msk.f32.mxu0 %vm4118_vm1, %v4117_v10 }
  0xe8   :  { %3793 = vmatpush3.msra.mxu1 %v322_v47 }
  0xe9   :  { %3797 = vmatprep.subr.mxu1 %v4117_v10 }
  0xeb   :  { %v3812_v2 = vpop.f32.mrf.mxu0 }
  0xec   :  { %v741_v14 = vadd.f32 %v3812_v2, %v3462_v6 }
  0xed   :  { %v735_v11 = vpop.f32.mrf.mxu0 }
  0xee   :  { %v736_v12 = vadd.f32 %v3462_v6, %v735_v11 }
 0x1a1   :  { %v403_v25 = vpop.f32.mrf.mxu1 }
 0x1a2   :  { %v483_v26 = vmul.f32 0.25, %v403_v25 }
 0x1a3   :  { %v3786_v27 = vpop.f32.mrf.mxu1 }
 0x1a4   :  { %v486_v28 = vsel %vm485_vm3, %v483_v26, -inf }
 0x1a5   :  { %487 = vmax.xlane.f32.xlu0 %v486_v28  ;;  %v479_v29 = vpop.f32.mrf.mxu1 }
 0x1a6   :  { %v484_v30 = vmul.f32 0.25, %v479_v29 }
 0x1a7   :  { %v3791_v31 = vpop.f32.mrf.mxu1 }
 0x1a8   :  { %v489_v32 = vsel %vm485_vm3, %v484_v30, -inf }
 0x1a9   :  { %490 = vmax.xlane.f32.xlu0 %v489_v32 }
 0x22e   :  { %v488_v33 = vpop.xlane.xlu0 %487 }
 0x22f   :  { %v492_v34 = vsub.f32 %v483_v26, %v488_v33 }
 0x231   :  { %v494_v35 = vmul.f32 1.442695, %v492_v34 }
 0x232   :  { %v491_v36 = vpop.xlane.xlu0 %490 }
 0x233   :  { %4047 = vpow2.f32 %v494_v35  ;;  %v493_v37 = vsub.f32 %v484_v30, %v491_v36 }
 0x235   :  { %v496_v38 = vmul.f32 1.442695, %v493_v37  ;;  %v3834_v37 = vpop.f32.mrf.mxu0 }
 0x237   :  { %4049 = vpow2.f32 %v496_v38  ;;  %v3478_v38 = vld [vmem:[%s4743_s6 + $0x1] ss:$0 sm:$0xff] }
 0x240   :  { %v4048_v39 = vpop.eup %4047 }
 0x241   :  { %v498_v40 = vsel %vm485_vm3, %v4048_v39, 0.0 }
 0x242   :  { %499 = vadd.xlane.f32.xlu1 %v498_v40  ;;  %v911_v40 = vpop.f32.mrf.mxu0 }
 0x244   :  { %v4050_v41 = vpop.eup %4049 }
 0x245   :  { %v501_v42 = vsel %vm485_vm3, %v4050_v41, 0.0 }
 0x246   :  { %502 = vadd.xlane.f32.xlu1 %v501_v42  ;;  %v655_v42 = vld [vmem:[%s4744_s7 + $0x8] sm:$0xff] }
 0x2cb   :  { %v500_v52 = vpop.xlane.xlu1 %499 }
 0x2cc   :  { %4051 = vrcp.f32 %v500_v52 }
 0x2cf   :  { %v503_v53 = vpop.xlane.xlu1 %502 }
 0x2d0   :  { %4053 = vrcp.f32 %v503_v53 }
 0x2d9   :  { %v4052_v54 = vpop.eup %4051 }
 0x2da   :  { %v506_v55 = vmul.f32 %v4052_v54, %v4048_v39  ;;  %v917_v39 = vadd.f32 %v3834_v37, %v3478_v38  ;;  %v1559_v37 = vld [vmem:[%s4750_s13 + $0x10] sm:$0xff] }
 0x2dc   :  { %3795 = vmatmul.mubr.msk.f32.vlgmr.msra.gmra.mxu1 %vm485_vm3, %v506_v55 }
 0x2dd   :  { %v4054_v57 = vpop.eup %4053  ;;  %3798 = vmatpush3.msra.mxu1 %v327_v45  ;;  %3799 = vmatprep.mubr.msk.f32.mxu1 %vm4118_vm1, %v4117_v10 }
 0x2de   :  { %3813 = vmatprep.subr.mxu1 %v3468_v56  ;;  %v507_v58 = vmul.f32 %v4054_v57, %v4050_v41  ;;  %v912_v41 = vadd.f32 %v3478_v38, %v911_v40  ;;  %v1558_v38 = vld [vmem:[%s4750_s13 + $0x8] sm:$0xff]  ;;  %v3496_v40 = vld [vmem:[%s4749_s12] ss:$0 sm:$0xff] }
 0x2e0   :  { %3800 = vmatmul.mubr.msk.f32.vlgmr.msra.gmra.mxu1 %vm485_vm3, %v507_v58  ;;  %3846 = vmatpush3.msra.mxu0 %v912_v41  ;;  %v3493_v58 = vld [vmem:[%s4745_s8] ss:$0 sm:$0xff] }
 0x2e1   :  { %3814 = vmatpush3.msra.mxu1 %v3468_v56  ;;  %3821 = vmatprep.mubr.msk.f32.mxu1 %vm76_vm0, %v4247_v8 }
 0x2e2   :  { %3815 = vmatprep.subr.mxu1 %v3467_v59  ;;  %3855 = vmatprep.subr.mxu0 %v3488_v50 }
 0x2e3   :  { %3816 = vmatpush3.msra.mxu1 %v3467_v59 }
 0x2e4   :  { %3817 = vmatprep.subr.mxu1 %v3466_v60 }
 0x2e5   :  { %3818 = vmatpush3.msra.mxu1 %v3466_v60 }
 0x2e6   :  { %3819 = vmatprep.subr.mxu1 %v3465_v61 }
 0x2e7   :  { %3820 = vmatpush3.msra.mxu1 %v3465_v61 }
 0x2e8   :  { %3822 = vmatmul.mubr.msk.f32.vlgmr.msra.gmra.mxu1 %vm76_vm0, %v4252_v9  ;;  %3835 = vmatprep.subr.mxu1 %v4117_v10 }
 0x2e9   :  { %3837 = vmatprep.mubr.msk.f32.mxu1 %vm4118_vm1, %v4117_v10 }
 0x39c   :  { %v4346_v62 = vpop.f32.mrf.mxu1 }
 0x39e   :  { %v3796_v63 = vpop.f32.mrf.mxu1 }
 0x3a0   :  { %v4348_v0 = vpop.f32.mrf.mxu1 }
 0x3a2   :  { %v3801_v1 = vpop.f32.mrf.mxu1 }
 0x3a8   :  { %v3823_v3 = vpop.f32.mrf.mxu1 }
 0x3a9   :  { %v829_v13 = vadd.f32 %v3823_v3, %v3470_v4 }
 0x3aa   :  { %v823_v5 = vpop.f32.mrf.mxu1 }
 0x3ab   :  { %v824_v7 = vadd.f32 %v3470_v4, %v823_v5 }
 0x3ad   :  { %3836 = vmatpush3.xpose.msk.msra.mxu1 %vm330_vm2, %v824_v7 }
 0x3ae   :  { %3840 = vmatprep.subr.mxu1 %v4117_v10 }
 0x3b0   :  { %3838 = vmatmul.mubr.msk.f32.vlgmr.msra.gmra.mxu1 %vm330_vm2, %v736_v12 }
 0x3b1   :  { %3841 = vmatpush3.xpose.msk.msra.mxu1 %vm330_vm2, %v829_v13  ;;  %3842 = vmatprep.mubr.msk.f32.mxu1 %vm4118_vm1, %v4117_v10 }
 0x3b2   :  { %3850 = vmatprep.subr.mxu1 %v4117_v10 }
 0x3b4   :  { %3843 = vmatmul.mubr.msk.f32.vlgmr.msra.gmra.mxu1 %vm330_vm2, %v741_v14 }
 0x3b5   :  { %3852 = vmatprep.mubr.msk.f32.mxu1 %vm4118_vm1, %v4117_v10  ;;  %3851 = vmatpush3.msra.mxu1 %v917_v39  ;;  %v1557_v39 = vld [vmem:[%s4750_s13] sm:$0xff] }
 0x3b6   :  { %3862 = vmatprep.subr.mxu1 %v655_v42 }
 0x470   :  { %v992_v19 = vpop.f32.mrf.mxu1 }
 0x471   :  { %v1072_v20 = vmul.f32 0.25, %v992_v19  ;;  %v1463_v19 = vld [vmem:[%s4748_s11] sm:$0xff] }
 0x472   :  { %v3839_v21 = vpop.f32.mrf.mxu1 }
 0x473   :  { %v1074_v22 = vsel %vm485_vm3, %v1072_v20, -inf }
 0x474   :  { %1075 = vmax.xlane.f32.xlu0 %v1074_v22  ;;  %v1068_v23 = vpop.f32.mrf.mxu1 }
 0x475   :  { %v1073_v24 = vmul.f32 0.25, %v1068_v23 }
 0x476   :  { %v3844_v25 = vpop.f32.mrf.mxu1 }
 0x477   :  { %v1077_v26 = vsel %vm485_vm3, %v1073_v24, -inf }
 0x478   :  { %1078 = vmax.xlane.f32.xlu1 %v1077_v26 }
 0x4fd   :  { %v1076_v27 = vpop.xlane.xlu0 %1075 }
 0x4fe   :  { %v1080_v28 = vsub.f32 %v1072_v20, %v1076_v27  ;;  %v3494_v27 = vld [vmem:[%s4746_s9] ss:$0 sm:$0xff] }
 0x500   :  { %v1082_v29 = vmul.f32 1.442695, %v1080_v28 }
 0x501   :  { %v1079_v30 = vpop.xlane.xlu1 %1078 }
 0x502   :  { %4055 = vpow2.f32 %v1082_v29  ;;  %v1081_v31 = vsub.f32 %v1073_v24, %v1079_v30 }
 0x504   :  { %v1084_v32 = vmul.f32 1.442695, %v1081_v31 }
 0x506   :  { %4057 = vpow2.f32 %v1084_v32  ;;  %v3495_v32 = vld [vmem:[%s4747_s10] ss:$0 sm:$0xff] }
 0x50f   :  { %v4056_v33 = vpop.eup %4055 }
 0x510   :  { %v1086_v34 = vsel %vm485_vm3, %v4056_v33, 0.0 }
 0x511   :  { %1087 = vadd.xlane.f32.xlu0 %v1086_v34 }
 0x513   :  { %v4058_v35 = vpop.eup %4057 }
 0x514   :  { %v1089_v36 = vsel %vm485_vm3, %v4058_v35, 0.0 }
 0x515   :  { %1090 = vadd.xlane.f32.xlu1 %v1089_v36  ;;  %v1560_v36 = vld [vmem:[%s4750_s13 + $0x18] sm:$0xff] }
 0x59a   :  { %v1088_v43 = vpop.xlane.xlu0 %1087 }
 0x59b   :  { %4059 = vrcp.f32 %v1088_v43 }
 0x59e   :  { %v1091_v44 = vpop.xlane.xlu1 %1090 }
 0x59f   :  { %4061 = vrcp.f32 %v1091_v44 }
 0x5a8   :  { %v4060_v45 = vpop.eup %4059 }
 0x5a9   :  { %v1094_v46 = vmul.f32 %v4060_v45, %v4056_v33 }
 0x5ab   :  { %3848 = vmatmul.mubr.msk.f32.vlgmr.msra.gmra.mxu0 %vm485_vm3, %v1094_v46 }
 0x5ac   :  { %v4062_v47 = vpop.eup %4061  ;;  %3856 = vmatpush3.msra.mxu0 %v3488_v50 }
 0x5ad   :  { %v1095_v48 = vmul.f32 %v4062_v47, %v4058_v35  ;;  %3857 = vmatprep.subr.mxu0 %v3487_v51  ;;  %v3499_v47 = vld [vmem:[%s4771_s24] ss:$0 sm:$0xff] }
 0x5ae   :  { %3858 = vmatpush3.msra.mxu0 %v3487_v51 }
 0x5af   :  { %3853 = vmatmul.mubr.msk.f32.vlgmr.msra.gmra.mxu1 %vm485_vm3, %v1095_v48 }
 0x5b0   :  { %3863 = vmatpush3.msra.mxu1 %v655_v42  ;;  %3866 = vmatprep.mubr.msk.f32.mxu1 %vm330_vm2, %v4346_v62 }
 0x5b1   :  { %3864 = vmatprep.subr.mxu1 %v654_v49 }
 0x5b2   :  { %3865 = vmatpush3.msra.mxu1 %v654_v49 }
 0x5b3   :  { %3867 = vmatmul.mubr.msk.f32.vlgmr.msra.gmra.mxu1 %vm330_vm2, %v4348_v0  ;;  %3880 = vmatprep.subr.mxu1 %v1560_v36 }
 0x5b4   :  { %3881 = vmatpush3.msra.mxu1 %v1560_v36 }
 0x5b5   :  { %3882 = vmatprep.subr.mxu1 %v1559_v37 }
 0x5b6   :  { %3883 = vmatpush3.msra.mxu1 %v1559_v37  ;;  %v3509_v37 = vld [vmem:[%s4741_s4 + $0x2] ss:$0 sm:$0xff] }
 0x5b7   :  { %3884 = vmatprep.subr.mxu1 %v1558_v38 }
 0x5b8   :  { %3885 = vmatpush3.msra.mxu1 %v1558_v38 }
 0x5b9   :  { %3886 = vmatprep.subr.mxu1 %v1557_v39 }
 0x5ba   :  { %3887 = vmatpush3.msra.mxu1 %v1557_v39 }
 0x66b   :  { %v1165_v52 = vpop.f32.mrf.mxu0 }
 0x66c   :  { %3859 = vmatprep.mubr.msk.f32.mxu0 %vm330_vm2, %v1165_v52 }
 0x66d   :  { %v3849_v53 = vpop.f32.mrf.mxu0 }
 0x66f   :  { %v1238_v54 = vpop.f32.mrf.mxu1 }
 0x670   :  { %3860 = vmatmul.mubr.msk.f32.vlgmr.msra.gmra.mxu0 %vm330_vm2, %v1238_v54 }
 0x671   :  { %v3854_v55 = vpop.f32.mrf.mxu1 }
 0x673   :  { %v3868_v56 = vpop.f32.mrf.mxu1 }
 0x675   :  { %v1398_v60 = vpop.f32.mrf.mxu1 }
 0x730   :  { %v3861_v57 = vpop.f32.mrf.mxu0 }
 0x731   :  { %v1404_v59 = vadd.f32 %v3868_v56, %v3861_v57 }
 0x732   :  { %v1317_v61 = vpop.f32.mrf.mxu0 }
 0x733   :  { %v1415_v62 = vadd.f32 %v3493_v58, %v1404_v59  ;;  %v1399_v63 = vadd.f32 %v1398_v60, %v1317_v61 }
 0x735   :  { %v1414_v0 = vadd.f32 %v3493_v58, %v1399_v63  ;;  %v1417_v1 = vadd.f32 %v1415_v62, %v4252_v9 }
 0x737   :  { %v1423_v2 = vsel %vm76_vm0, %v1417_v1, 0.0  ;;  %v1416_v3 = vadd.f32 %v1414_v0, %v4247_v8  ;;  %v1466_v8 = vld [vmem:[%s4748_s11 + $0x18] sm:$0xff] }
 0x738   :  { %1424 = vadd.xlane.f32.xlu1 %v1423_v2  ;;  %3869 = vmatprep.subr.mxu0 %v1466_v8  ;;  %v3507_v2 = vld [vmem:[%s4768_s14 + $0x58] sm:$0xff] }
 0x739   :  { %v1420_v4 = vsel %vm76_vm0, %v1416_v3, 0.0  ;;  %3870 = vmatpush3.msra.mxu0 %v1466_v8 }
 0x73a   :  { %1421 = vadd.xlane.f32.xlu0 %v1420_v4  ;;  %3871 = vmatprep.subr.mxu0 %v1465_v17  ;;  %v3506_v4 = vld [vmem:[%s4768_s14 + $0x50] sm:$0xff] }
 0x73b   :  { %3872 = vmatpush3.msra.mxu0 %v1465_v17 }
 0x73c   :  { %3873 = vmatprep.subr.mxu0 %v1464_v18 }
 0x73d   :  { %3874 = vmatpush3.msra.mxu0 %v1464_v18 }
 0x73e   :  { %3875 = vmatprep.subr.mxu0 %v1463_v19 }
 0x73f   :  { %3876 = vmatpush3.msra.mxu0 %v1463_v19  ;;  %v3502_v19 = vld [vmem:[%s4752_s15] ss:$0 sm:$0xff] }
 0x740   :  { %3891 = vmatprep.subr.mxu0 %v3507_v2 }
 0x7c1   :  { %v1425_v5 = vpop.xlane.xlu1 %1424 }
 0x7c2   :  { %v1428_v6 = vmul.f32 0.03125, %v1425_v5  ;;  %v3514_v5 = vld [vmem:[%s4767_s20 + $0x50] sm:$0xff] }
 0x7c3   :  { %v1422_v7 = vpop.xlane.xlu0 %1421 }
 0x7c4   :  { %v1430_v11 = vsub.f32 %v1417_v1, %v1428_v6  ;;  %v1427_v12 = vmul.f32 0.03125, %v1422_v7  ;;  %v3505_v6 = vld [vmem:[%s4768_s14 + $0x48] sm:$0xff] }
 0x7c5   :  { %v3513_v7 = vld [vmem:[%s4767_s20 + $0x48] sm:$0xff] }
 0x7c6   :  { %v1429_v13 = vsub.f32 %v1416_v3, %v1427_v12  ;;  %v1432_v14 = vmul.f32 %v1430_v11, %v1430_v11  ;;  %v3515_v3 = vld [vmem:[%s4767_s20 + $0x58] sm:$0xff]  ;;  %v3512_v12 = vld [vmem:[%s4767_s20 + $0x40] sm:$0xff] }
 0x7c7   :  { %3902 = vmatprep.subr.mxu1 %v3515_v3 }
 0x7c8   :  { %v1436_v15 = vsel %vm76_vm0, %v1432_v14, 0.0  ;;  %v1431_v16 = vmul.f32 %v1429_v13, %v1429_v13 }
 0x7c9   :  { %1437 = vadd.xlane.f32.xlu1 %v1436_v15 }
 0x7ca   :  { %v1433_v9 = vsel %vm76_vm0, %v1431_v16, 0.0 }
 0x7cb   :  { %1434 = vadd.xlane.f32.xlu0 %v1433_v9 }
 0x852   :  { %v1438_v20 = vpop.xlane.xlu1 %1437 }
 0x853   :  { %v1440_v21 = vmul.f32 0.03125, %v1438_v20 }
 0x854   :  { %v1435_v22 = vpop.xlane.xlu0 %1434 }
 0x855   :  { %v1442_v23 = vadd.f32 1e-05, %v1440_v21  ;;  %v1439_v24 = vmul.f32 0.03125, %v1435_v22 }
 0x857   :  { %4063 = vrsqrt.f32 %v1442_v23  ;;  %v1441_v25 = vadd.f32 1e-05, %v1439_v24  ;;  %v3503_v24 = vld [vmem:[%s4753_s16] ss:$0 sm:$0xff] }
 0x859   :  { %4065 = vrsqrt.f32 %v1441_v25 }
 0x864   :  { %v4064_v26 = vpop.eup %4063 }
 0x865   :  { %v1446_v28 = vmul.f32 %v4064_v26, %v1430_v11  ;;  %v3504_v11 = vld [vmem:[%s4768_s14 + $0x40] sm:$0xff] }
 0x866   :  { %v4066_v29 = vpop.eup %4065 }
 0x867   :  { %v1445_v30 = vmul.f32 %v4066_v29, %v1429_v13  ;;  %v1454_v31 = vmul.f32 %v3494_v27, %v1446_v28  ;;  %v3523_v13 = vld [vmem:[%s4770_s29 + $0x58] sm:$0xff]  ;;  %v3522_v28 = vld [vmem:[%s4770_s29 + $0x50] sm:$0xff]  ;;  %v3521_v29 = vld [vmem:[%s4770_s29 + $0x48] sm:$0xff] }
 0x869   :  { %v1453_v33 = vmul.f32 %v3494_v27, %v1445_v30  ;;  %v1462_v35 = vadd.f32 %v3495_v32, %v1454_v31  ;;  %v3520_v30 = vld [vmem:[%s4770_s29 + $0x40] sm:$0xff] }
 0x86b   :  { %v1461_v34 = vadd.f32 %v3495_v32, %v1453_v33  ;;  %v3517_v33 = vld [vmem:[%s4742_s5 + $0x2] ss:$0 sm:$0xff] }
 0x86d   :  { %3877 = vmatprep.mubr.msk.f32.mxu0 %vm76_vm0, %v1461_v34 }
 0x86e   :  { %3878 = vmatmul.mubr.msk.f32.vlgmr.msra.gmra.mxu0 %vm76_vm0, %v1462_v35 }
 0x86f   :  { %3892 = vmatpush3.msra.mxu0 %v3507_v2 }
 0x870   :  { %3893 = vmatprep.subr.mxu0 %v3506_v4 }
 0x871   :  { %3894 = vmatpush3.msra.mxu0 %v3506_v4 }
 0x872   :  { %3895 = vmatprep.subr.mxu0 %v3505_v6 }
 0x873   :  { %3896 = vmatpush3.msra.mxu0 %v3505_v6  ;;  %v3538_v6 = vld [vmem:[%s4768_s14 + $0x70] sm:$0xff] }
 0x874   :  { %3897 = vmatprep.subr.mxu0 %v3504_v11 }
 0x875   :  { %3898 = vmatpush3.msra.mxu0 %v3504_v11  ;;  %v3537_v11 = vld [vmem:[%s4768_s14 + $0x68] sm:$0xff] }
 0x876   :  { %3913 = vmatprep.subr.mxu0 %v3523_v13 }
 0x92e   :  { %v3879_v41 = vpop.f32.mrf.mxu0 }
 0x92f   :  { %v1552_v42 = vadd.f32 %v3879_v41, %v3496_v40  ;;  %v3525_v41 = vld [vmem:[%s4743_s6 + $0x2] ss:$0 sm:$0xff] }
 0x930   :  { %v1546_v43 = vpop.f32.mrf.mxu0 }
 0x931   :  { %v1547_v44 = vadd.f32 %v3496_v40, %v1546_v43  ;;  %v1556_v46 = vmax.f32 %v1552_v42, 0.0 }
 0x933   :  { %v1555_v45 = vmax.f32 %v1547_v44, 0.0 }
 0x935   :  { %3888 = vmatprep.mubr.msk.f32.mxu1 %vm76_vm0, %v1555_v45 }
 0x936   :  { %3889 = vmatmul.mubr.msk.f32.vlgmr.msra.gmra.mxu1 %vm76_vm0, %v1556_v46 }
 0x937   :  { %3903 = vmatpush3.msra.mxu1 %v3515_v3 }
 0x938   :  { %3904 = vmatprep.subr.mxu1 %v3514_v5 }
 0x939   :  { %3905 = vmatpush3.msra.mxu1 %v3514_v5 }
 0x93a   :  { %3906 = vmatprep.subr.mxu1 %v3513_v7 }
 0x93b   :  { %3907 = vmatpush3.msra.mxu1 %v3513_v7 }
 0x93c   :  { %3908 = vmatprep.subr.mxu1 %v3512_v12 }
 0x93d   :  { %3909 = vmatpush3.msra.mxu1 %v3512_v12 }
 0x93e   :  { %3924 = vmatprep.subr.mxu1 %v4117_v10 }
 0x9f6   :  { %v3890_v48 = vpop.f32.mrf.mxu1 }
 0x9f7   :  { %v1646_v49 = vadd.f32 %v3890_v48, %v3499_v47 }
 0x9f8   :  { %v1640_v50 = vpop.f32.mrf.mxu1 }
 0x9f9   :  { %v1641_v51 = vadd.f32 %v3499_v47, %v1640_v50  ;;  %v1650_v52 = vadd.f32 %v1646_v49, %v1462_v35 }
 0x9fb   :  { %v1656_v53 = vsel %vm76_vm0, %v1650_v52, 0.0  ;;  %v1649_v54 = vadd.f32 %v1641_v51, %v1461_v34 }
 0x9fc   :  { %1657 = vadd.xlane.f32.xlu1 %v1656_v53 }
 0x9fd   :  { %v1653_v55 = vsel %vm76_vm0, %v1649_v54, 0.0 }
 0x9fe   :  { %1654 = vadd.xlane.f32.xlu0 %v1653_v55 }
 0xa85   :  { %v1658_v56 = vpop.xlane.xlu1 %1657 }
 0xa86   :  { %v1660_v57 = vmul.f32 0.03125, %v1658_v56 }
 0xa87   :  { %v1655_v58 = vpop.xlane.xlu0 %1654 }
 0xa88   :  { %v1662_v59 = vsub.f32 %v1650_v52, %v1660_v57  ;;  %v1659_v60 = vmul.f32 0.03125, %v1655_v58 }
 0xa8a   :  { %v1661_v61 = vsub.f32 %v1649_v54, %v1659_v60  ;;  %v1664_v62 = vmul.f32 %v1662_v59, %v1662_v59 }
 0xa8c   :  { %v1668_v63 = vsel %vm76_vm0, %v1664_v62, 0.0  ;;  %v1663_v0 = vmul.f32 %v1661_v61, %v1661_v61 }
 0xa8d   :  { %1669 = vadd.xlane.f32.xlu1 %v1668_v63 }
 0xa8e   :  { %v1665_v1 = vsel %vm76_vm0, %v1663_v0, 0.0  ;;  %v3539_v0 = vld [vmem:[%s4768_s14 + $0x78] sm:$0xff] }
 0xa8f   :  { %1666 = vadd.xlane.f32.xlu0 %v1665_v1  ;;  %v3547_v1 = vld [vmem:[%s4767_s20 + $0x78] sm:$0xff] }
 0xb16   :  { %v1670_v14 = vpop.xlane.xlu1 %1669 }
 0xb17   :  { %v1672_v15 = vmul.f32 0.03125, %v1670_v14  ;;  %v3546_v14 = vld [vmem:[%s4767_s20 + $0x70] sm:$0xff] }
 0xb18   :  { %v1667_v16 = vpop.xlane.xlu0 %1666 }
 0xb19   :  { %v1674_v9 = vadd.f32 1e-05, %v1672_v15  ;;  %v1671_v8 = vmul.f32 0.03125, %v1667_v16  ;;  %v3545_v15 = vld [vmem:[%s4767_s20 + $0x68] sm:$0xff]  ;;  %v3555_v16 = vld [vmem:[%s4770_s29 + $0x78] sm:$0xff] }
 0xb1b   :  { %4067 = vrsqrt.f32 %v1674_v9  ;;  %v1673_v17 = vadd.f32 1e-05, %v1671_v8  ;;  %v3544_v9 = vld [vmem:[%s4767_s20 + $0x60] sm:$0xff]  ;;  %v3554_v8 = vld [vmem:[%s4770_s29 + $0x70] sm:$0xff] }
 0xb1d   :  { %4069 = vrsqrt.f32 %v1673_v17  ;;  %v3553_v17 = vld [vmem:[%s4770_s29 + $0x68] sm:$0xff] }
 0xb28   :  { %v4068_v18 = vpop.eup %4067 }
 0xb29   :  { %v1678_v20 = vmul.f32 %v4068_v18, %v1662_v59  ;;  %v3552_v18 = vld [vmem:[%s4770_s29 + $0x60] sm:$0xff] }
 0xb2a   :  { %v4070_v21 = vpop.eup %4069 }
 0xb2b   :  { %v1677_v22 = vmul.f32 %v4070_v21, %v1661_v61  ;;  %v1686_v23 = vmul.f32 %v3502_v19, %v1678_v20 }
 0xb2d   :  { %v1685_v25 = vmul.f32 %v3502_v19, %v1677_v22  ;;  %v4499_v27 = vadd.f32 %v3503_v24, %v1686_v23 }
 0xb2f   :  { %v4497_v26 = vadd.f32 %v3503_v24, %v1685_v25  ;;  %v3549_v25 = vld [vmem:[%s4742_s5 + $0x3] ss:$0 sm:$0xff] }
 0xb31   :  { %3899 = vmatprep.mubr.msk.f32.mxu0 %vm76_vm0, %v4497_v26  ;;  %3910 = vmatprep.mubr.msk.f32.mxu1 %vm76_vm0, %v4497_v26 }
 0xb32   :  { %3900 = vmatmul.mubr.msk.f32.vlgmr.msra.gmra.mxu0 %vm76_vm0, %v4499_v27  ;;  %3911 = vmatmul.mubr.msk.f32.vlgmr.msra.gmra.mxu1 %vm76_vm0, %v4499_v27 }
 0xb33   :  { %3914 = vmatpush3.msra.mxu0 %v3523_v13  ;;  %3921 = vmatprep.mubr.msk.f32.mxu0 %vm76_vm0, %v4497_v26  ;;  %v3536_v13 = vld [vmem:[%s4768_s14 + $0x60] sm:$0xff] }
 0xb34   :  { %3915 = vmatprep.subr.mxu0 %v3522_v28  ;;  %3926 = vmatprep.mubr.msk.f32.mxu1 %vm4118_vm1, %v4117_v10 }
 0xb35   :  { %3916 = vmatpush3.msra.mxu0 %v3522_v28 }
 0xb36   :  { %3917 = vmatprep.subr.mxu0 %v3521_v29 }
 0xb37   :  { %3918 = vmatpush3.msra.mxu0 %v3521_v29 }
 0xb38   :  { %3919 = vmatprep.subr.mxu0 %v3520_v30 }
 0xb39   :  { %3920 = vmatpush3.msra.mxu0 %v3520_v30 }
 0xb3a   :  { %3922 = vmatmul.mubr.msk.f32.vlgmr.msra.gmra.mxu0 %vm76_vm0, %v4499_v27  ;;  %3934 = vmatprep.subr.mxu0 %v4117_v10 }
 0xb3b   :  { %3936 = vmatprep.mubr.msk.f32.mxu0 %vm4118_vm1, %v4117_v10 }
 0xbf2   :  { %v3901_v31 = vpop.f32.mrf.mxu0  ;;  %v3912_v32 = vpop.f32.mrf.mxu1 }
 0xbf3   :  { %v1874_v39 = vadd.f32 %v3912_v32, %v3517_v33  ;;  %v1786_v42 = vadd.f32 %v3901_v31, %v3509_v37  ;;  %v3541_v31 = vld [vmem:[%s4741_s4 + $0x3] ss:$0 sm:$0xff] }
 0xbf4   :  { %v1868_v34 = vpop.f32.mrf.mxu1  ;;  %v1780_v35 = vpop.f32.mrf.mxu0 }
 0xbf5   :  { %v1869_v36 = vadd.f32 %v3517_v33, %v1868_v34  ;;  %v1781_v38 = vadd.f32 %v3509_v37, %v1780_v35  ;;  %v3557_v35 = vld [vmem:[%s4743_s6 + $0x3] ss:$0 sm:$0xff] }
 0xbf7   :  { %3925 = vmatpush3.xpose.msk.msra.mxu1 %vm330_vm2, %v1869_v36 }
 0xbf8   :  { %3929 = vmatprep.subr.mxu1 %v4117_v10 }
 0xbfa   :  { %v3923_v40 = vpop.f32.mrf.mxu0  ;;  %3927 = vmatmul.mubr.msk.f32.vlgmr.msra.gmra.mxu1 %vm330_vm2, %v1781_v38 }
 0xbfb   :  { %3930 = vmatpush3.xpose.msk.msra.mxu1 %vm330_vm2, %v1874_v39  ;;  %3931 = vmatprep.mubr.msk.f32.mxu1 %vm4118_vm1, %v4117_v10  ;;  %v1962_v44 = vadd.f32 %v3923_v40, %v3525_v41 }
 0xbfc   :  { %v1956_v43 = vpop.f32.mrf.mxu0  ;;  %3939 = vmatprep.subr.mxu1 %v4117_v10 }
 0xbfd   :  { %v1957_v45 = vadd.f32 %v3525_v41, %v1956_v43 }
 0xbfe   :  { %3932 = vmatmul.mubr.msk.f32.vlgmr.msra.gmra.mxu1 %vm330_vm2, %v1786_v42 }
 0xbff   :  { %3935 = vmatpush3.msra.mxu0 %v1957_v45  ;;  %3940 = vmatpush3.msra.mxu1 %v1962_v44 }
 0xc00   :  { %3941 = vmatprep.mubr.msk.f32.mxu1 %vm4118_vm1, %v4117_v10  ;;  %3944 = vmatprep.subr.mxu0 %v3539_v0 }
 0xc01   :  { %3955 = vmatprep.subr.mxu1 %v3547_v1 }
 0xcba   :  { %v2037_v46 = vpop.f32.mrf.mxu1 }
 0xcbb   :  { %v2117_v47 = vmul.f32 0.25, %v2037_v46 }
 0xcbc   :  { %v3928_v48 = vpop.f32.mrf.mxu1 }
 0xcbd   :  { %v2119_v49 = vsel %vm485_vm3, %v2117_v47, -inf }
 0xcbe   :  { %2120 = vmax.xlane.f32.xlu1 %v2119_v49  ;;  %v2113_v50 = vpop.f32.mrf.mxu1 }
 0xcbf   :  { %v2118_v51 = vmul.f32 0.25, %v2113_v50 }
 0xcc0   :  { %v3933_v52 = vpop.f32.mrf.mxu1 }
 0xcc1   :  { %v2122_v53 = vsel %vm485_vm3, %v2118_v51, -inf }
 0xcc2   :  { %2123 = vmax.xlane.f32.xlu0 %v2122_v53 }
 0xd47   :  { %v2121_v54 = vpop.xlane.xlu1 %2120 }
 0xd48   :  { %v2125_v55 = vsub.f32 %v2117_v47, %v2121_v54 }
 0xd4a   :  { %v2127_v56 = vmul.f32 1.442695, %v2125_v55 }
 0xd4b   :  { %v2124_v57 = vpop.xlane.xlu0 %2123 }
 0xd4c   :  { %4071 = vpow2.f32 %v2127_v56  ;;  %v2126_v58 = vsub.f32 %v2118_v51, %v2124_v57 }
 0xd4e   :  { %v2129_v59 = vmul.f32 1.442695, %v2126_v58  ;;  %v3535_v58 = vld [vmem:[%s4744_s7 + $0x28] sm:$0xff] }
 0xd50   :  { %4073 = vpow2.f32 %v2129_v59 }
 0xd59   :  { %v4072_v60 = vpop.eup %4071 }
 0xd5a   :  { %v2131_v61 = vsel %vm485_vm3, %v4072_v60, 0.0 }
 0xd5b   :  { %2132 = vadd.xlane.f32.xlu1 %v2131_v61 }
 0xd5d   :  { %v4074_v62 = vpop.eup %4073 }
 0xd5e   :  { %v2134_v63 = vsel %vm485_vm3, %v4074_v62, 0.0 }
 0xd5f   :  { %2135 = vadd.xlane.f32.xlu0 %v2134_v63 }
 0xde4   :  { %v2133_v2 = vpop.xlane.xlu1 %2132 }
 0xde5   :  { %4075 = vrcp.f32 %v2133_v2  ;;  %v3567_v2 = vld [vmem:[%s4744_s7 + $0x38] sm:$0xff] }
 0xde8   :  { %v2136_v3 = vpop.xlane.xlu0 %2135 }
 0xde9   :  { %4077 = vrcp.f32 %v2136_v3  ;;  %v3566_v3 = vld [vmem:[%s4744_s7 + $0x30] sm:$0xff] }
 0xdf2   :  { %v4076_v4 = vpop.eup %4075 }
 0xdf3   :  { %v2139_v5 = vmul.f32 %v4076_v4, %v4072_v60 }
 0xdf5   :  { %3937 = vmatmul.mubr.msk.f32.vlgmr.msra.gmra.mxu0 %vm485_vm3, %v2139_v5 }
 0xdf6   :  { %v4078_v7 = vpop.eup %4077  ;;  %3945 = vmatpush3.msra.mxu0 %v3539_v0  ;;  %3952 = vmatprep.mubr.msk.f32.mxu0 %vm76_vm0, %v4497_v26 }
 0xdf7   :  { %3946 = vmatprep.subr.mxu0 %v3538_v6  ;;  %v2140_v12 = vmul.f32 %v4078_v7, %v4074_v62 }
 0xdf8   :  { %3947 = vmatpush3.msra.mxu0 %v3538_v6 }
 0xdf9   :  { %3948 = vmatprep.subr.mxu0 %v3537_v11  ;;  %3942 = vmatmul.mubr.msk.f32.vlgmr.msra.gmra.mxu1 %vm485_vm3, %v2140_v12 }
 0xdfa   :  { %3949 = vmatpush3.msra.mxu0 %v3537_v11  ;;  %3956 = vmatpush3.msra.mxu1 %v3547_v1  ;;  %v3534_v1 = vld [vmem:[%s4744_s7 + $0x20] sm:$0xff] }
 0xdfb   :  { %3950 = vmatprep.subr.mxu0 %v3536_v13  ;;  %3957 = vmatprep.subr.mxu1 %v3546_v14 }
 0xdfc   :  { %3963 = vmatprep.mubr.msk.f32.mxu1 %vm76_vm0, %v4497_v26  ;;  %3951 = vmatpush3.msra.mxu0 %v3536_v13  ;;  %v3573_v13 = vld [vmem:[%s4745_s8 + $0x1] ss:$0 sm:$0xff] }
 0xdfd   :  { %3958 = vmatpush3.msra.mxu1 %v3546_v14  ;;  %3953 = vmatmul.mubr.msk.f32.vlgmr.msra.gmra.mxu0 %vm76_vm0, %v4499_v27 }
 0xdfe   :  { %3959 = vmatprep.subr.mxu1 %v3545_v15  ;;  %3966 = vmatprep.subr.mxu0 %v3555_v16 }
 0xdff   :  { %3960 = vmatpush3.msra.mxu1 %v3545_v15  ;;  %3967 = vmatpush3.msra.mxu0 %v3555_v16 }
 0xe00   :  { %3974 = vmatprep.mubr.msk.f32.mxu0 %vm76_vm0, %v4497_v26  ;;  %3961 = vmatprep.subr.mxu1 %v3544_v9 }
 0xe01   :  { %3968 = vmatprep.subr.mxu0 %v3554_v8  ;;  %3962 = vmatpush3.msra.mxu1 %v3544_v9 }
 0xe02   :  { %3969 = vmatpush3.msra.mxu0 %v3554_v8  ;;  %3964 = vmatmul.mubr.msk.f32.vlgmr.msra.gmra.mxu1 %vm76_vm0, %v4499_v27 }
 0xe03   :  { %3970 = vmatprep.subr.mxu0 %v3553_v17  ;;  %3977 = vmatprep.subr.mxu1 %v4117_v10 }
 0xe04   :  { %3971 = vmatpush3.msra.mxu0 %v3553_v17  ;;  %3979 = vmatprep.mubr.msk.f32.mxu1 %vm4118_vm1, %v4117_v10 }
 0xe05   :  { %3972 = vmatprep.subr.mxu0 %v3552_v18 }
 0xe06   :  { %3973 = vmatpush3.msra.mxu0 %v3552_v18 }
 0xe07   :  { %3975 = vmatmul.mubr.msk.f32.vlgmr.msra.gmra.mxu0 %vm76_vm0, %v4499_v27  ;;  %3987 = vmatprep.subr.mxu0 %v4117_v10 }
 0xe08   :  { %3989 = vmatprep.mubr.msk.f32.mxu0 %vm4118_vm1, %v4117_v10 }
 0xeb5   :  { %v4606_v19 = vpop.f32.mrf.mxu0 }
 0xeb7   :  { %v3938_v20 = vpop.f32.mrf.mxu0 }
 0xeb9   :  { %v4608_v21 = vpop.f32.mrf.mxu1 }
 0xebb   :  { %v3943_v22 = vpop.f32.mrf.mxu1 }
 0xebd   :  { %v3954_v23 = vpop.f32.mrf.mxu0 }
 0xebe   :  { %v2375_v38 = vadd.f32 %v3954_v23, %v3541_v31 }
 0xebf   :  { %v2369_v29 = vpop.f32.mrf.mxu0 }
 0xec0   :  { %v2370_v33 = vadd.f32 %v3541_v31, %v2369_v29 }
 0xec2   :  { %v3965_v24 = vpop.f32.mrf.mxu1 }
 0xec3   :  { %v2463_v34 = vadd.f32 %v3965_v24, %v3549_v25 }
 0xec4   :  { %v2457_v28 = vpop.f32.mrf.mxu1 }
 0xec5   :  { %v2458_v30 = vadd.f32 %v3549_v25, %v2457_v28 }
 0xec7   :  { %v3976_v32 = vpop.f32.mrf.mxu0  ;;  %3978 = vmatpush3.xpose.msk.msra.mxu1 %vm330_vm2, %v2458_v30 }
 0xec8   :  { %3982 = vmatprep.subr.mxu1 %v4117_v10  ;;  %v2551_v39 = vadd.f32 %v3976_v32, %v3557_v35 }
 0xec9   :  { %v2545_v36 = vpop.f32.mrf.mxu0 }
 0xeca   :  { %v2546_v37 = vadd.f32 %v3557_v35, %v2545_v36  ;;  %3980 = vmatmul.mubr.msk.f32.vlgmr.msra.gmra.mxu1 %vm330_vm2, %v2370_v33  ;;  %v3580_v33 = vld [vmem:[%s4748_s11 + $0x30] sm:$0xff]  ;;  %v3578_v35 = vld [vmem:[%s4748_s11 + $0x20] sm:$0xff] }
 0xecb   :  { %3983 = vmatpush3.xpose.msk.msra.mxu1 %vm330_vm2, %v2463_v34  ;;  %3984 = vmatprep.mubr.msk.f32.mxu1 %vm4118_vm1, %v4117_v10  ;;  %v3579_v34 = vld [vmem:[%s4748_s11 + $0x28] sm:$0xff] }
 0xecc   :  { %3988 = vmatpush3.msra.mxu0 %v2546_v37  ;;  %3992 = vmatprep.subr.mxu1 %v4117_v10 }
 0xecd   :  { %3997 = vmatprep.subr.mxu0 %v3567_v2 }
 0xece   :  { %3985 = vmatmul.mubr.msk.f32.vlgmr.msra.gmra.mxu1 %vm330_vm2, %v2375_v38 }
 0xecf   :  { %3993 = vmatpush3.msra.mxu1 %v2551_v39  ;;  %3994 = vmatprep.mubr.msk.f32.mxu1 %vm4118_vm1, %v4117_v10 }
 0xed0   :  { %4004 = vmatprep.subr.mxu1 %v3535_v58 }
 0xf8a   :  { %v2626_v40 = vpop.f32.mrf.mxu1 }
 0xf8b   :  { %v2706_v41 = vmul.f32 0.25, %v2626_v40 }
 0xf8c   :  { %v3981_v42 = vpop.f32.mrf.mxu1 }
 0xf8d   :  { %v2708_v43 = vsel %vm485_vm3, %v2706_v41, -inf }
 0xf8e   :  { %2709 = vmax.xlane.f32.xlu0 %v2708_v43  ;;  %v2702_v44 = vpop.f32.mrf.mxu1  ;;  %v3576_v43 = vld [vmem:[%s4746_s9 + $0x1] ss:$0 sm:$0xff] }
 0xf8f   :  { %v2707_v45 = vmul.f32 0.25, %v2702_v44 }
 0xf90   :  { %v3986_v46 = vpop.f32.mrf.mxu1 }
 0xf91   :  { %v2711_v47 = vsel %vm485_vm3, %v2707_v45, -inf }
 0xf92   :  { %2712 = vmax.xlane.f32.xlu1 %v2711_v47 }
0x1017   :  { %v2710_v48 = vpop.xlane.xlu0 %2709 }
0x1018   :  { %v2714_v49 = vsub.f32 %v2706_v41, %v2710_v48  ;;  %v3577_v48 = vld [vmem:[%s4747_s10 + $0x1] ss:$0 sm:$0xff] }
0x101a   :  { %v2716_v50 = vmul.f32 1.442695, %v2714_v49 }
0x101b   :  { %v2713_v51 = vpop.xlane.xlu1 %2712 }
0x101c   :  { %4079 = vpow2.f32 %v2716_v50  ;;  %v2715_v52 = vsub.f32 %v2707_v45, %v2713_v51 }
0x101e   :  { %v2718_v53 = vmul.f32 1.442695, %v2715_v52  ;;  %v3589_v52 = vld [vmem:[%s4750_s13 + $0x38] sm:$0xff] }
0x1020   :  { %4081 = vpow2.f32 %v2718_v53  ;;  %v3588_v53 = vld [vmem:[%s4750_s13 + $0x30] sm:$0xff] }
0x1029   :  { %v4080_v54 = vpop.eup %4079 }
0x102a   :  { %v2720_v55 = vsel %vm485_vm3, %v4080_v54, 0.0 }
0x102b   :  { %2721 = vadd.xlane.f32.xlu0 %v2720_v55  ;;  %v3586_v55 = vld [vmem:[%s4750_s13 + $0x20] sm:$0xff] }
0x102d   :  { %v4082_v56 = vpop.eup %4081 }
0x102e   :  { %v2723_v57 = vsel %vm485_vm3, %v4082_v56, 0.0 }
0x102f   :  { %2724 = vadd.xlane.f32.xlu1 %v2723_v57 }
0x10b4   :  { %v2722_v59 = vpop.xlane.xlu0 %2721 }
0x10b5   :  { %4083 = vrcp.f32 %v2722_v59 }
0x10b8   :  { %v2725_v60 = vpop.xlane.xlu1 %2724 }
0x10b9   :  { %4085 = vrcp.f32 %v2725_v60 }
0x10c2   :  { %v4084_v61 = vpop.eup %4083 }
0x10c3   :  { %v2728_v62 = vmul.f32 %v4084_v61, %v4080_v54  ;;  %v3587_v54 = vld [vmem:[%s4750_s13 + $0x28] sm:$0xff] }
0x10c5   :  { %3990 = vmatmul.mubr.msk.f32.vlgmr.msra.gmra.mxu0 %vm485_vm3, %v2728_v62 }
0x10c6   :  { %v4086_v63 = vpop.eup %4085  ;;  %3998 = vmatpush3.msra.mxu0 %v3567_v2 }
0x10c7   :  { %v2729_v0 = vmul.f32 %v4086_v63, %v4082_v56  ;;  %3999 = vmatprep.subr.mxu0 %v3566_v3  ;;  %v3583_v56 = vld [vmem:[%s4749_s12 + $0x1] ss:$0 sm:$0xff] }
0x10c8   :  { %4000 = vmatpush3.msra.mxu0 %v3566_v3  ;;  %v3591_v63 = vld [vmem:[%s4771_s24 + $0x1] ss:$0 sm:$0xff] }
0x10c9   :  { %3995 = vmatmul.mubr.msk.f32.vlgmr.msra.gmra.mxu1 %vm485_vm3, %v2729_v0 }
0x10ca   :  { %4005 = vmatpush3.msra.mxu1 %v3535_v58  ;;  %4008 = vmatprep.mubr.msk.f32.mxu1 %vm330_vm2, %v4606_v19 }
0x10cb   :  { %4006 = vmatprep.subr.mxu1 %v3534_v1 }
0x10cc   :  { %4007 = vmatpush3.msra.mxu1 %v3534_v1 }
0x10cd   :  { %4009 = vmatmul.mubr.msk.f32.vlgmr.msra.gmra.mxu1 %vm330_vm2, %v4608_v21  ;;  %4022 = vmatprep.subr.mxu1 %v3589_v52 }
0x10ce   :  { %4023 = vmatpush3.msra.mxu1 %v3589_v52 }
0x10cf   :  { %4024 = vmatprep.subr.mxu1 %v3588_v53 }
0x10d0   :  { %4025 = vmatpush3.msra.mxu1 %v3588_v53 }
0x10d1   :  { %4026 = vmatprep.subr.mxu1 %v3587_v54 }
0x10d2   :  { %4027 = vmatpush3.msra.mxu1 %v3587_v54 }
0x10d3   :  { %4028 = vmatprep.subr.mxu1 %v3586_v55 }
0x10d4   :  { %4029 = vmatpush3.msra.mxu1 %v3586_v55 }
0x1185   :  { %v2799_v4 = vpop.f32.mrf.mxu0 }
0x1186   :  { %4001 = vmatprep.mubr.msk.f32.mxu0 %vm330_vm2, %v2799_v4 }
0x1187   :  { %v3991_v5 = vpop.f32.mrf.mxu0 }
0x1189   :  { %v2872_v6 = vpop.f32.mrf.mxu1 }
0x118a   :  { %4002 = vmatmul.mubr.msk.f32.vlgmr.msra.gmra.mxu0 %vm330_vm2, %v2872_v6 }
0x118b   :  { %v3996_v7 = vpop.f32.mrf.mxu1 }
0x118d   :  { %v4010_v11 = vpop.f32.mrf.mxu1 }
0x118f   :  { %v3032_v15 = vpop.f32.mrf.mxu1 }
0x124a   :  { %v4003_v12 = vpop.f32.mrf.mxu0 }
0x124b   :  { %v3038_v14 = vadd.f32 %v4010_v11, %v4003_v12 }
0x124c   :  { %v2951_v16 = vpop.f32.mrf.mxu0 }
0x124d   :  { %v3050_v9 = vadd.f32 %v3573_v13, %v3038_v14  ;;  %v3033_v8 = vadd.f32 %v3032_v15, %v2951_v16 }
0x124f   :  { %v3049_v17 = vadd.f32 %v3573_v13, %v3033_v8  ;;  %v3052_v18 = vadd.f32 %v3050_v9, %v4499_v27 }
0x1251   :  { %v3060_v19 = vsel %vm76_vm0, %v3052_v18, 0.0  ;;  %v3051_v20 = vadd.f32 %v3049_v17, %v4497_v26  ;;  %v3581_v26 = vld [vmem:[%s4748_s11 + $0x38] sm:$0xff] }
0x1252   :  { %3061 = vadd.xlane.f32.xlu1 %v3060_v19  ;;  %4011 = vmatprep.subr.mxu0 %v3581_v26  ;;  %v3340_v19 = vld [vmem:[%s4754_s17 + $0x18] sm:$0xff] }
0x1253   :  { %v3057_v21 = vsel %vm76_vm0, %v3051_v20, 0.0  ;;  %4012 = vmatpush3.msra.mxu0 %v3581_v26 }
0x1254   :  { %3058 = vadd.xlane.f32.xlu0 %v3057_v21  ;;  %4013 = vmatprep.subr.mxu0 %v3580_v33  ;;  %v3338_v21 = vld [vmem:[%s4754_s17 + $0x8] sm:$0xff] }
0x1255   :  { %4014 = vmatpush3.msra.mxu0 %v3580_v33 }
0x1256   :  { %4015 = vmatprep.subr.mxu0 %v3579_v34 }
0x1257   :  { %4016 = vmatpush3.msra.mxu0 %v3579_v34 }
0x1258   :  { %4017 = vmatprep.subr.mxu0 %v3578_v35 }
0x1259   :  { %4018 = vmatpush3.msra.mxu0 %v3578_v35 }
0x125a   :  { %4033 = vmatprep.subr.mxu0 %v4117_v10 }
0x12db   :  { %v3062_v22 = vpop.xlane.xlu1 %3061 }
0x12dc   :  { %v3064_v23 = vmul.f32 0.03125, %v3062_v22  ;;  %v3337_v22 = vld [vmem:[%s4754_s17] sm:$0xff] }
0x12dd   :  { %v3059_v24 = vpop.xlane.xlu0 %3058 }
0x12de   :  { %v3066_v25 = vsub.f32 %v3052_v18, %v3064_v23  ;;  %v3063_v28 = vmul.f32 0.03125, %v3059_v24 }
0x12e0   :  { %v3065_v29 = vsub.f32 %v3051_v20, %v3063_v28  ;;  %v3068_v30 = vmul.f32 %v3066_v25, %v3066_v25  ;;  %v3339_v20 = vld [vmem:[%s4754_s17 + $0x10] sm:$0xff] }
0x12e2   :  { %v3072_v31 = vsel %vm76_vm0, %v3068_v30, 0.0  ;;  %v3067_v32 = vmul.f32 %v3065_v29, %v3065_v29 }
0x12e3   :  { %3073 = vadd.xlane.f32.xlu1 %v3072_v31 }
0x12e4   :  { %v3069_v27 = vsel %vm76_vm0, %v3067_v32, 0.0  ;;  %v3596_v32 = vld [vmem:[%s4752_s15 + $0x1] ss:$0 sm:$0xff]  ;;  %s4119_s15 = smov [#allocation2]  }
0x12e5   :  { %3070 = vadd.xlane.f32.xlu0 %v3069_v27  ;;  %s3434_s4 = sshll.u32 %s4119_s15, 4  ;;  %s3435_s4 = int_to_ptr.vmem [resolvable:$true] %s3434_s4 }
0x12e6   :  { %p4100_p1 = scmp.lt.s32.totalorder %s3435_s4, %s3435_s4 }
0x136c   :  { %v3074_v36 = vpop.xlane.xlu1 %3073 }
0x136d   :  { %v3076_v37 = vmul.f32 0.03125, %v3074_v36 }
0x136e   :  { %v3071_v38 = vpop.xlane.xlu0 %3070 }
0x136f   :  { %v3078_v39 = vadd.f32 1e-05, %v3076_v37  ;;  %v3075_v40 = vmul.f32 0.03125, %v3071_v38 }
0x1371   :  { %4087 = vrsqrt.f32 %v3078_v39  ;;  %v3077_v41 = vadd.f32 1e-05, %v3075_v40 }
0x1373   :  { %4089 = vrsqrt.f32 %v3077_v41  ;;  %v3598_v41 = vld [vmem:[%s4755_s18] ss:$0 sm:$0xff] }
0x137e   :  { %v4088_v42 = vpop.eup %4087 }
0x137f   :  { %v3082_v44 = vmul.f32 %v4088_v42, %v3066_v25 }
0x1380   :  { %v4090_v45 = vpop.eup %4089 }
0x1381   :  { %v3081_v46 = vmul.f32 %v4090_v45, %v3065_v29  ;;  %v3090_v47 = vmul.f32 %v3576_v43, %v3082_v44 }
0x1383   :  { %v3089_v49 = vmul.f32 %v3576_v43, %v3081_v46  ;;  %v3098_v51 = vadd.f32 %v3577_v48, %v3090_v47 }
0x1385   :  { %v3097_v50 = vadd.f32 %v3577_v48, %v3089_v49 }
0x1387   :  { %4019 = vmatprep.mubr.msk.f32.mxu0 %vm76_vm0, %v3097_v50 }
0x1388   :  { %4020 = vmatmul.mubr.msk.f32.vlgmr.msra.gmra.mxu0 %vm76_vm0, %v3098_v51 }
0x1389   :  { %4041 = vmatprep.mubr.msk.f32.mxu0 %vm4118_vm1, %v4117_v10  ;;  %4034 = vmatpush3.msra.mxu0 %v3340_v19 }
0x138a   :  { %4035 = vmatprep.subr.mxu0 %v4117_v10 }
0x138b   :  { %4036 = vmatpush3.msra.mxu0 %v3339_v20 }
0x138c   :  { %4037 = vmatprep.subr.mxu0 %v4117_v10 }
0x138d   :  { %4038 = vmatpush3.msra.mxu0 %v3338_v21 }
0x138e   :  { %4039 = vmatprep.subr.mxu0 %v4117_v10  ;;  %v3597_v10 = vld [vmem:[%s4753_s16 + $0x1] ss:$0 sm:$0xff]  ;;  %s4095_s16 = scalar_lea.vmem %s3435_s4, 32 }
0x138f   :  { %4040 = vmatpush3.msra.mxu0 %v3337_v22  ;;  %p4096_p0 = scmp.ne.s32.totalorder %s3435_s4, %s4095_s16  ;;  %p4101_p2 = scmp.lt.s32.totalorder %s4095_s16, %s4095_s16 }
0x1391   :  { %p4102_p3 = por %p4101_p2, %p4100_p1 }
0x1393   :  { %p4103_p4 = pnand %p4102_p3, %p4096_p0 }
0x1448   :  { %v4021_v57 = vpop.f32.mrf.mxu0 }
0x1449   :  { %v3190_v58 = vadd.f32 %v4021_v57, %v3583_v56 }
0x144a   :  { %v3184_v59 = vpop.f32.mrf.mxu0 }
0x144b   :  { %v3185_v60 = vadd.f32 %v3583_v56, %v3184_v59  ;;  %v3194_v62 = vmax.f32 %v3190_v58, 0.0 }
0x144d   :  { %v3193_v61 = vmax.f32 %v3185_v60, 0.0 }
0x144f   :  { %4030 = vmatprep.mubr.msk.f32.mxu1 %vm76_vm0, %v3193_v61 }
0x1450   :  { %4031 = vmatmul.mubr.msk.f32.vlgmr.msra.gmra.mxu1 %vm76_vm0, %v3194_v62 }
0x1510   :  { %v4032_v0 = vpop.f32.mrf.mxu1 }
0x1511   :  { %v3286_v1 = vadd.f32 %v4032_v0, %v3591_v63 }
0x1512   :  { %v3280_v2 = vpop.f32.mrf.mxu1 }
0x1513   :  { %v3281_v3 = vadd.f32 %v3591_v63, %v3280_v2  ;;  %v3290_v4 = vadd.f32 %v3286_v1, %v3098_v51 }
0x1515   :  { %v3298_v5 = vsel %vm76_vm0, %v3290_v4, 0.0  ;;  %v3289_v6 = vadd.f32 %v3281_v3, %v3097_v50 }
0x1516   :  { %3299 = vadd.xlane.f32.xlu1 %v3298_v5 }
0x1517   :  { %v3295_v7 = vsel %vm76_vm0, %v3289_v6, 0.0 }
0x1518   :  { %3296 = vadd.xlane.f32.xlu0 %v3295_v7 }
0x159f   :  { %v3300_v11 = vpop.xlane.xlu1 %3299 }
0x15a0   :  { %v3302_v12 = vmul.f32 0.03125, %v3300_v11 }
0x15a1   :  { %v3297_v13 = vpop.xlane.xlu0 %3296 }
0x15a2   :  { %v3304_v14 = vsub.f32 %v3290_v4, %v3302_v12  ;;  %v3301_v15 = vmul.f32 0.03125, %v3297_v13 }
0x15a4   :  { %v3303_v16 = vsub.f32 %v3289_v6, %v3301_v15  ;;  %v3306_v9 = vmul.f32 %v3304_v14, %v3304_v14 }
0x15a6   :  { %v3310_v8 = vsel %vm76_vm0, %v3306_v9, 0.0  ;;  %v3305_v17 = vmul.f32 %v3303_v16, %v3303_v16 }
0x15a7   :  { %3311 = vadd.xlane.f32.xlu1 %v3310_v8 }
0x15a8   :  { %v3307_v18 = vsel %vm76_vm0, %v3305_v17, 0.0 }
0x15a9   :  { %3308 = vadd.xlane.f32.xlu0 %v3307_v18 }
0x1630   :  { %v3312_v23 = vpop.xlane.xlu1 %3311 }
0x1631   :  { %v3314_v24 = vmul.f32 0.03125, %v3312_v23 }
0x1632   :  { %v3309_v25 = vpop.xlane.xlu0 %3308 }
0x1633   :  { %v3316_v28 = vadd.f32 1e-05, %v3314_v24  ;;  %v3313_v29 = vmul.f32 0.03125, %v3309_v25 }
0x1635   :  { %4091 = vrsqrt.f32 %v3316_v28  ;;  %v3315_v30 = vadd.f32 1e-05, %v3313_v29 }
0x1637   :  { %4093 = vrsqrt.f32 %v3315_v30 }
0x1642   :  { %v4092_v31 = vpop.eup %4091 }
0x1643   :  { %v3320_v27 = vmul.f32 %v4092_v31, %v3304_v14 }
0x1644   :  { %v4094_v26 = vpop.eup %4093 }
0x1645   :  { %v3319_v33 = vmul.f32 %v4094_v26, %v3303_v16  ;;  %v3328_v34 = vmul.f32 %v3596_v32, %v3320_v27 }
0x1647   :  { %v3327_v35 = vmul.f32 %v3596_v32, %v3319_v33  ;;  %v3336_v36 = vadd.f32 %v3597_v10, %v3328_v34 }
0x1649   :  { %v3335_v37 = vadd.f32 %v3597_v10, %v3327_v35  ;;  %v3351_v39 = vrot.slane %v3336_v36, 6 }
0x164b   :  { %v3350_v38 = vrot.slane %v3335_v37, 7 }
0x164d   :  { %v3353_v40 = vsel %vm3352_vm4, %v3351_v39, %v3350_v38 }
0x164e   :  { %4042 = vmatmul.mubr.msk.f32.vlgmr.msra.gmra.mxu0 %vm76_vm0, %v3353_v40 }
0x170e   :  { %v3422_v42 = vpop.f32.mrf.mxu0 }
0x170f   :  { %v3423_v43 = vadd.f32 %v3598_v41, %v3422_v42 }
0x1710   :  { %v4043_v44 = vpop.f32.mrf.mxu0 }
0x1711   :  { %3427 = vst.msk [vmem:[#allocation2] sm:$0x3] %vm3426_vm5, %v3423_v43 }
0x1712   :  { %4106 = shalt.err (!%p4103_p4)
}
0x1713   :  { %3437 = dma.vmem_to_hbm [thread:$0]  %s3435_s4, 32, %s4756_s19, [#allocation3]  }
0x1714   :  { %4115 = dma.done.wait [#allocation3], 32  }
0x1715   :  { %4116 = vsyncadd [#allocation3], 4294967264 }
0x1716   :  { %3441 = vsyncpa [#allocation3], 1 }

</bundles_post_ra>
